<compile_context>
chip_gen: v7x
topology: tpu7x:2x2x1
jax: 0.10.0
libtpu: 0.0.40
codegen_flags: <defaults>
</compile_context>

<pallas_src>
import jax
import jax.numpy as jnp
from jax.experimental import pallas as pl
from jax.experimental.pallas import tpu as pltpu

# ----- small, shape-consistent config -----
B, O, V_DIM, B_DIM = 2, 8, 32, 8           # batch, num_objs, obj_dim, b_dim
S, NTOKEN, E, H, NANS = 8, 50, 32, 32, 16  # seq_len, vocab, emb_dim, num_hid, num_answers
BP = 8                                     # batch padded to one full sublane
NPAD = 128                                 # lane-dense width for gathered gi / logits

# ----- packed weight-slab row layout (all blocks start at lane 0) -----
R_WHH = 0                     # rows   0: 32  gru_whh merged [H, 3H]
R_VEC = R_WHH + H             # rows  32: 40  bias / small-vector block (8 rows)
R_AWV = R_VEC + 8             # rows  40: 72  att v-proj weight [V_DIM, H]
R_AWQ = R_AWV + V_DIM         # rows  72:104  att q-proj weight [H, H]
R_W1 = R_AWQ + H              # rows 104:136  classifier hidden weight [H, 2H]
R_WQV = R_W1 + H              # rows 136:200  block-diag q_net/v_net weight [H+V, 2H]
R_W2 = R_WQV + H + V_DIM      # rows 200:264  classifier output weight (padded) [2H, 128]
R_TOT = R_W2 + 2 * H          # 264 rows total -> one [264,128] f32 DMA (132 KiB)


# ---------------- fused forward kernel: GRU -> attention -> head ----------------
def fused_kernel(gi_ref, v2_ref, w_ref, out_ref):
    H3 = 3 * H
    # ---- static views into the packed slab (loaded once) ----
    whh = w_ref[R_WHH:R_WHH + H, 0:H3]                                # [H, 3H]
    bhh_n = jnp.broadcast_to(w_ref[R_VEC + 0:R_VEC + 1, 0:H], (BP, H))  # hoisted bcast
    abv = w_ref[R_VEC + 1:R_VEC + 2, 0:H]
    abq = w_ref[R_VEC + 2:R_VEC + 3, 0:H]
    awl = w_ref[R_VEC + 3:R_VEC + 4, 0:H]
    abl = w_ref[R_VEC + 4:R_VEC + 5, 0:1]
    bqv = w_ref[R_VEC + 5:R_VEC + 6, 0:2 * H]
    b1 = w_ref[R_VEC + 6:R_VEC + 7, 0:2 * H]
    b2 = w_ref[R_VEC + 7:R_VEC + 8, 0:NPAD]
    awv = w_ref[R_AWV:R_AWV + V_DIM, 0:H]
    awq = w_ref[R_AWQ:R_AWQ + H, 0:H]
    w1 = w_ref[R_W1:R_W1 + H, 0:2 * H]
    wqv = w_ref[R_WQV:R_WQV + H + V_DIM, 0:2 * H]
    w2 = w_ref[R_W2:R_W2 + 2 * H, 0:NPAD]

    # ---- stage 1: single-layer GRU (input projection pre-folded into emb table) ----
    gi_r = gi_ref[:, 0:H]            # [S*BP, H]  sliced ONCE, per-step slices are
    gi_z = gi_ref[:, H:2 * H]        #            8-row (one-vreg) aligned selects
    gi_n = gi_ref[:, 2 * H:H3]

    h = jnp.zeros((BP, H), jnp.float32)
    for t in range(S):               # statically unrolled (S=8), one basic block
        lo = t * BP
        gh = jnp.dot(h, whh, preferred_element_type=jnp.float32)     # [BP, 3H]
        r = jax.nn.sigmoid(gi_r[lo:lo + BP] + gh[:, 0:H])
        z = jax.nn.sigmoid(gi_z[lo:lo + BP] + gh[:, H:2 * H])
        n = jnp.tanh(gi_n[lo:lo + BP] + r * (gh[:, 2 * H:H3] + bhh_n))
        h = (1.0 - z) * n + z * h
    q_emb = h                                                         # [BP, H]

    # ---- stage 2: NewAttention over objects + weighted sum of v ----
    v2 = v2_ref[...]                                                  # [BP*O, V]
    vproj = jax.nn.relu(jnp.dot(v2, awv, preferred_element_type=jnp.float32) + abv)
    qproj = jax.nn.relu(jnp.dot(q_emb, awq, preferred_element_type=jnp.float32) + abq)
    qw = qproj * awl                 # fold the 1xH attention linear into qproj
    logits = jnp.sum(vproj.reshape(BP, O, H) * qw[:, None, :], axis=-1) + abl  # [BP, O]

    m = jnp.max(logits, axis=1, keepdims=True)
    e = jnp.exp(logits - m)
    att = e / jnp.sum(e, axis=1, keepdims=True)                       # exact divide
    v_emb = jnp.sum(att[:, :, None] * v2.reshape(BP, O, V_DIM), axis=1)  # [BP, V]

    # ---- stage 3: fused q_net/v_net (block-diagonal matmul) + classifier ----
    qv = jnp.concatenate([q_emb, v_emb], axis=-1)                     # [BP, H+V]
    reprs = jax.nn.relu(jnp.dot(qv, wqv, preferred_element_type=jnp.float32) + bqv)
    joint = reprs[:, 0:H] * reprs[:, H:2 * H]                         # [BP, H]
    hdn = jax.nn.relu(jnp.dot(joint, w1, preferred_element_type=jnp.float32) + b1)
    # whole-tile [8,128] lane-dense store; wrapper slices [:B, :NANS]
    out_ref[...] = jnp.dot(hdn, w2, preferred_element_type=jnp.float32) + b2


# ---------------- weight preprocessing (done once, outside the forward) ----------------
def prepare_params(p):
    bih, bhh = p["gru_bih"], p["gru_bhh"]
    # fold b_hr / b_hz into the input-projection bias; b_hn stays inside r*(...)
    bi = jnp.concatenate([bih[:, 0:H] + bhh[:, 0:H],
                          bih[:, H:2 * H] + bhh[:, H:2 * H],
                          bih[:, 2 * H:3 * H]], axis=-1)              # [1, 3H]
    # fold the GRU input projection into the embedding table (NTOKEN is tiny here)
    emb_proj = p["emb"] @ p["gru_wih"] + bi                           # [NTOKEN+1, 3H]
    emb_proj = jnp.zeros((NTOKEN + 1, NPAD), jnp.float32).at[:, 0:3 * H].set(emb_proj)

    # block-diagonal fused q_net / v_net weight: concat(q_emb, v_emb) @ w_qv
    w_qv = jnp.zeros((H + V_DIM, 2 * H), jnp.float32)
    w_qv = w_qv.at[0:H, 0:H].set(p["qnet_w"])
    w_qv = w_qv.at[H:, H:].set(p["vnet_w"])
    b_qv = jnp.concatenate([p["qnet_b"], p["vnet_b"]], axis=-1)       # [1, 2H]

    # pack every weight / bias into ONE lane-dense [R_TOT, 128] slab
    slab = jnp.zeros((R_TOT, NPAD), jnp.float32)
    slab = slab.at[R_WHH:R_WHH + H, 0:3 * H].set(p["gru_whh"])
    slab = slab.at[R_VEC + 0, 0:H].set(bhh[0, 2 * H:3 * H])           # b_hn
    slab = slab.at[R_VEC + 1, 0:H].set(p["att_bv"][0])
    slab = slab.at[R_VEC + 2, 0:H].set(p["att_bq"][0])
    slab = slab.at[R_VEC + 3, 0:H].set(p["att_wl"][0])
    slab = slab.at[R_VEC + 4, 0:1].set(p["att_bl"][0])
    slab = slab.at[R_VEC + 5, 0:2 * H].set(b_qv[0])
    slab = slab.at[R_VEC + 6, 0:2 * H].set(p["cls_b1"][0])
    slab = slab.at[R_VEC + 7, 0:NANS].set(p["cls_b2"][0])
    slab = slab.at[R_AWV:R_AWV + V_DIM, 0:H].set(p["att_wv"])
    slab = slab.at[R_AWQ:R_AWQ + H, 0:H].set(p["att_wq"])
    slab = slab.at[R_W1:R_W1 + H, 0:2 * H].set(p["cls_w1"])
    slab = slab.at[R_WQV:R_WQV + H + V_DIM, 0:2 * H].set(w_qv)
    slab = slab.at[R_W2:R_W2 + 2 * H, 0:NANS].set(p["cls_w2"])

    return {"emb_proj": emb_proj, "slab": slab}


# ---------------- full BaseModel.forward ----------------
def base_model_forward(kp, v, b, q, labels):
    # b (spatial features) and labels are unused in the eval-mode forward (as in the
    # reference module).
    # Embedding lookup stays as XLA glue (gather), but now pulls pre-projected GRU
    # inputs (emb_proj rows) with time-major, sublane-padded ids -> gi is [S*8, 128].
    q_pad = jnp.zeros((BP, S), q.dtype).at[0:B].set(q)
    gi = jnp.take(kp["emb_proj"], q_pad.T, axis=0).reshape(S * BP, NPAD)
    # batch-pad v to a full sublane and flatten objects
    v_pad = jnp.zeros((BP, O, V_DIM), v.dtype).at[0:B].set(v)
    v2 = v_pad.reshape(BP * O, V_DIM)                                 # [BP*O, V]

    out = pl.pallas_call(
        fused_kernel,
        out_shape=jax.ShapeDtypeStruct((BP, NPAD), jnp.float32),
        in_specs=[pl.BlockSpec(memory_space=pltpu.MemorySpace.VMEM)] * 3,
        out_specs=pl.BlockSpec(memory_space=pltpu.MemorySpace.VMEM),
    )(gi, v2, kp["slab"])
    return out[:B, :NANS]


# ---------------- pure-JAX reference for correctness ----------------
def ref_forward(p, v, b, q, labels):
    w = jnp.take(p["emb"], q, axis=0)                  # [B, S, E]
    h = jnp.zeros((B, H), jnp.float32)
    for t in range(S):
        x_t = w[:, t, :]
        gi = x_t @ p["gru_wih"] + p["gru_bih"]
        gh = h @ p["gru_whh"] + p["gru_bhh"]
        i_r, i_z, i_n = gi[:, 0:H], gi[:, H:2 * H], gi[:, 2 * H:3 * H]
        h_r, h_z, h_n = gh[:, 0:H], gh[:, H:2 * H], gh[:, 2 * H:3 * H]
        r = jax.nn.sigmoid(i_r + h_r)
        z = jax.nn.sigmoid(i_z + h_z)
        n = jnp.tanh(i_n + r * h_n)
        h = (1.0 - z) * n + z * h
    q_emb = h
    vproj = jax.nn.relu(jnp.einsum("bov,vh->boh", v, p["att_wv"]) + p["att_bv"])
    qproj = jax.nn.relu(q_emb @ p["att_wq"] + p["att_bq"])
    joint = vproj * qproj[:, None, :]
    logits = jnp.sum(joint * p["att_wl"], axis=-1) + p["att_bl"]
    att = jax.nn.softmax(logits, axis=1)
    v_emb = jnp.sum(att[:, :, None] * v, axis=1)
    q_repr = jax.nn.relu(q_emb @ p["qnet_w"] + p["qnet_b"])
    v_repr = jax.nn.relu(v_emb @ p["vnet_w"] + p["vnet_b"])
    jr = q_repr * v_repr
    hdn = jax.nn.relu(jr @ p["cls_w1"] + p["cls_b1"])
    return hdn @ p["cls_w2"] + p["cls_b2"]


def init_params(key):
    ks = jax.random.split(key, 16)
    n = lambda k, s, sc=0.1: (sc * jax.random.normal(k, s)).astype(jnp.float32)
    emb = n(ks[0], (NTOKEN + 1, E))
    emb = emb.at[NTOKEN].set(0.0)                      # padding_idx row
    return {
        "emb": emb,
        "gru_wih": n(ks[1], (E, 3 * H)), "gru_whh": n(ks[2], (H, 3 * H)),
        "gru_bih": n(ks[3], (1, 3 * H)), "gru_bhh": n(ks[4], (1, 3 * H)),
        "att_wv": n(ks[5], (V_DIM, H)), "att_bv": n(ks[6], (1, H)),
        "att_wq": n(ks[7], (H, H)),     "att_bq": n(ks[8], (1, H)),
        "att_wl": n(ks[9], (1, H)),     "att_bl": n(ks[10], (1, 1)),
        "qnet_w": n(ks[11], (H, H)),    "qnet_b": jnp.zeros((1, H), jnp.float32),
        "vnet_w": n(ks[12], (V_DIM, H)), "vnet_b": jnp.zeros((1, H), jnp.float32),
        "cls_w1": n(ks[13], (H, 2 * H)), "cls_b1": jnp.zeros((1, 2 * H), jnp.float32),
        "cls_w2": n(ks[14], (2 * H, NANS)), "cls_b2": jnp.zeros((1, NANS), jnp.float32),
    }


if __name__ == "__main__":
    key = jax.random.PRNGKey(0)
    kpar, kv, kb, kq, kl = jax.random.split(key, 5)
    params = init_params(kpar)
    kparams = prepare_params(params)

    v = jax.random.normal(kv, (B, O, V_DIM), jnp.float32)
    b = jax.random.normal(kb, (B, O, B_DIM), jnp.float32)       # unused by forward
    q = jax.random.randint(kq, (B, S), 0, NTOKEN, jnp.int32)
    labels = jax.random.normal(kl, (B, NANS), jnp.float32)      # unused by forward

    fwd = jax.jit(base_model_forward)
    logits = jax.block_until_ready(fwd(kparams, v, b, q, labels))
    ref = jax.block_until_ready(ref_forward(params, v, b, q, labels))

    assert logits.shape == (B, NANS), logits.shape
    assert jnp.allclose(logits, ref, rtol=1e-4, atol=1e-4), (
        f"max abs err {jnp.max(jnp.abs(logits - ref))}")
    print("KERNEL_OK")
</pallas_src>

<mosaic_0001>
module attributes {stable_mosaic.version = 11 : i64} {
  func.func @fused_kernel(%arg0: memref<64x128xf32, #tpu.memory_space<vmem>>, %arg1: memref<64x32xf32, #tpu.memory_space<vmem>>, %arg2: memref<264x128xf32, #tpu.memory_space<vmem>>, %arg3: memref<8x128xf32, #tpu.memory_space<vmem>>) attributes {dimension_semantics = [], scalar_prefetch = 0 : i64, scratch_operands = 0 : i64, tpu.core_type = #tpu.core_type<tc>} {
    %c0 = arith.constant 0 : index
    %c0_0 = arith.constant 0 : index
    %0 = vector.load %arg2[%c0, %c0_0] : memref<264x128xf32, #tpu.memory_space<vmem>>, vector<32x96xf32>
    %c32 = arith.constant 32 : index
    %c0_1 = arith.constant 0 : index
    %1 = vector.load %arg2[%c32, %c0_1] : memref<264x128xf32, #tpu.memory_space<vmem>>, vector<1x32xf32>
    %2 = vector.shape_cast %1 : vector<1x32xf32> to vector<1x32xf32>
    %3 = vector.broadcast %2 : vector<1x32xf32> to vector<8x32xf32>
    %c33 = arith.constant 33 : index
    %c0_2 = arith.constant 0 : index
    %4 = vector.load %arg2[%c33, %c0_2] : memref<264x128xf32, #tpu.memory_space<vmem>>, vector<1x32xf32>
    %c34 = arith.constant 34 : index
    %c0_3 = arith.constant 0 : index
    %5 = vector.load %arg2[%c34, %c0_3] : memref<264x128xf32, #tpu.memory_space<vmem>>, vector<1x32xf32>
    %c35 = arith.constant 35 : index
    %c0_4 = arith.constant 0 : index
    %6 = vector.load %arg2[%c35, %c0_4] : memref<264x128xf32, #tpu.memory_space<vmem>>, vector<1x32xf32>
    %c36 = arith.constant 36 : index
    %c0_5 = arith.constant 0 : index
    %7 = vector.load %arg2[%c36, %c0_5] : memref<264x128xf32, #tpu.memory_space<vmem>>, vector<1x1xf32>
    %c37 = arith.constant 37 : index
    %c0_6 = arith.constant 0 : index
    %8 = vector.load %arg2[%c37, %c0_6] : memref<264x128xf32, #tpu.memory_space<vmem>>, vector<1x64xf32>
    %c38 = arith.constant 38 : index
    %c0_7 = arith.constant 0 : index
    %9 = vector.load %arg2[%c38, %c0_7] : memref<264x128xf32, #tpu.memory_space<vmem>>, vector<1x64xf32>
    %c39 = arith.constant 39 : index
    %c0_8 = arith.constant 0 : index
    %10 = vector.load %arg2[%c39, %c0_8] : memref<264x128xf32, #tpu.memory_space<vmem>>, vector<1x128xf32>
    %c40 = arith.constant 40 : index
    %c0_9 = arith.constant 0 : index
    %11 = vector.load %arg2[%c40, %c0_9] : memref<264x128xf32, #tpu.memory_space<vmem>>, vector<32x32xf32>
    %c72 = arith.constant 72 : index
    %c0_10 = arith.constant 0 : index
    %12 = vector.load %arg2[%c72, %c0_10] : memref<264x128xf32, #tpu.memory_space<vmem>>, vector<32x32xf32>
    %c104 = arith.constant 104 : index
    %c0_11 = arith.constant 0 : index
    %13 = vector.load %arg2[%c104, %c0_11] : memref<264x128xf32, #tpu.memory_space<vmem>>, vector<32x64xf32>
    %c136 = arith.constant 136 : index
    %c0_12 = arith.constant 0 : index
    %14 = vector.load %arg2[%c136, %c0_12] : memref<264x128xf32, #tpu.memory_space<vmem>>, vector<64x64xf32>
    %c200 = arith.constant 200 : index
    %c0_13 = arith.constant 0 : index
    %15 = vector.load %arg2[%c200, %c0_13] : memref<264x128xf32, #tpu.memory_space<vmem>>, vector<64x128xf32>
    %c0_14 = arith.constant 0 : index
    %c0_15 = arith.constant 0 : index
    %16 = vector.load %arg0[%c0_14, %c0_15] : memref<64x128xf32, #tpu.memory_space<vmem>>, vector<64x32xf32>
    %c0_16 = arith.constant 0 : index
    %c32_17 = arith.constant 32 : index
    %17 = vector.load %arg0[%c0_16, %c32_17] : memref<64x128xf32, #tpu.memory_space<vmem>>, vector<64x32xf32>
    %c0_18 = arith.constant 0 : index
    %c64 = arith.constant 64 : index
    %18 = vector.load %arg0[%c0_18, %c64] : memref<64x128xf32, #tpu.memory_space<vmem>>, vector<64x32xf32>
    %cst = arith.constant 0.000000e+00 : f32
    %19 = vector.broadcast %cst : f32 to vector<8x32xf32>
    %cst_19 = arith.constant dense<0.000000e+00> : vector<8x96xf32>
    %20 = tpu.matmul %19, %0, %cst_19 {dimension_numbers = #tpu.dot_dimension_numbers<[1], [0], [0], [1], [0, 0, 1, 1], [], []>} : vector<8x32xf32>, vector<32x96xf32>, vector<8x96xf32> -> vector<8x96xf32>
    %21 = vector.extract_strided_slice %16 {offsets = [0, 0], sizes = [8, 32], strides = [1, 1]} : vector<64x32xf32> to vector<8x32xf32>
    %22 = vector.extract_strided_slice %20 {offsets = [0, 0], sizes = [8, 32], strides = [1, 1]} : vector<8x96xf32> to vector<8x32xf32>
    %23 = arith.addf %21, %22 : vector<8x32xf32>
    %24 = arith.negf %23 : vector<8x32xf32>
    %25 = math.exp %24 : vector<8x32xf32>
    %cst_20 = arith.constant 1.000000e+00 : f32
    %26 = vector.broadcast %cst_20 : f32 to vector<8x32xf32>
    %27 = arith.addf %26, %25 : vector<8x32xf32>
    %28 = arith.divf %26, %27 : vector<8x32xf32>
    %29 = vector.extract_strided_slice %17 {offsets = [0, 0], sizes = [8, 32], strides = [1, 1]} : vector<64x32xf32> to vector<8x32xf32>
    %30 = vector.extract_strided_slice %20 {offsets = [0, 32], sizes = [8, 32], strides = [1, 1]} : vector<8x96xf32> to vector<8x32xf32>
    %31 = arith.addf %29, %30 : vector<8x32xf32>
    %32 = arith.negf %31 : vector<8x32xf32>
    %33 = math.exp %32 : vector<8x32xf32>
    %cst_21 = arith.constant 1.000000e+00 : f32
    %34 = vector.broadcast %cst_21 : f32 to vector<8x32xf32>
    %35 = arith.addf %34, %33 : vector<8x32xf32>
    %36 = arith.divf %34, %35 : vector<8x32xf32>
    %37 = vector.extract_strided_slice %18 {offsets = [0, 0], sizes = [8, 32], strides = [1, 1]} : vector<64x32xf32> to vector<8x32xf32>
    %38 = vector.extract_strided_slice %20 {offsets = [0, 64], sizes = [8, 32], strides = [1, 1]} : vector<8x96xf32> to vector<8x32xf32>
    %39 = arith.addf %38, %3 : vector<8x32xf32>
    %40 = arith.mulf %28, %39 : vector<8x32xf32>
    %41 = arith.addf %37, %40 : vector<8x32xf32>
    %42 = math.tanh %41 : vector<8x32xf32>
    %cst_22 = arith.constant 1.000000e+00 : f32
    %43 = vector.broadcast %cst_22 : f32 to vector<8x32xf32>
    %44 = arith.subf %43, %36 : vector<8x32xf32>
    %45 = arith.mulf %44, %42 : vector<8x32xf32>
    %46 = arith.mulf %36, %19 : vector<8x32xf32>
    %47 = arith.addf %45, %46 : vector<8x32xf32>
    %cst_23 = arith.constant dense<0.000000e+00> : vector<8x96xf32>
    %48 = tpu.matmul %47, %0, %cst_23 {dimension_numbers = #tpu.dot_dimension_numbers<[1], [0], [0], [1], [0, 0, 1, 1], [], []>} : vector<8x32xf32>, vector<32x96xf32>, vector<8x96xf32> -> vector<8x96xf32>
    %49 = vector.extract_strided_slice %16 {offsets = [8, 0], sizes = [8, 32], strides = [1, 1]} : vector<64x32xf32> to vector<8x32xf32>
    %50 = vector.extract_strided_slice %48 {offsets = [0, 0], sizes = [8, 32], strides = [1, 1]} : vector<8x96xf32> to vector<8x32xf32>
    %51 = arith.addf %49, %50 : vector<8x32xf32>
    %52 = arith.negf %51 : vector<8x32xf32>
    %53 = math.exp %52 : vector<8x32xf32>
    %cst_24 = arith.constant 1.000000e+00 : f32
    %54 = vector.broadcast %cst_24 : f32 to vector<8x32xf32>
    %55 = arith.addf %54, %53 : vector<8x32xf32>
    %56 = arith.divf %54, %55 : vector<8x32xf32>
    %57 = vector.extract_strided_slice %17 {offsets = [8, 0], sizes = [8, 32], strides = [1, 1]} : vector<64x32xf32> to vector<8x32xf32>
    %58 = vector.extract_strided_slice %48 {offsets = [0, 32], sizes = [8, 32], strides = [1, 1]} : vector<8x96xf32> to vector<8x32xf32>
    %59 = arith.addf %57, %58 : vector<8x32xf32>
    %60 = arith.negf %59 : vector<8x32xf32>
    %61 = math.exp %60 : vector<8x32xf32>
    %cst_25 = arith.constant 1.000000e+00 : f32
    %62 = vector.broadcast %cst_25 : f32 to vector<8x32xf32>
    %63 = arith.addf %62, %61 : vector<8x32xf32>
    %64 = arith.divf %62, %63 : vector<8x32xf32>
    %65 = vector.extract_strided_slice %18 {offsets = [8, 0], sizes = [8, 32], strides = [1, 1]} : vector<64x32xf32> to vector<8x32xf32>
    %66 = vector.extract_strided_slice %48 {offsets = [0, 64], sizes = [8, 32], strides = [1, 1]} : vector<8x96xf32> to vector<8x32xf32>
    %67 = arith.addf %66, %3 : vector<8x32xf32>
    %68 = arith.mulf %56, %67 : vector<8x32xf32>
    %69 = arith.addf %65, %68 : vector<8x32xf32>
    %70 = math.tanh %69 : vector<8x32xf32>
    %cst_26 = arith.constant 1.000000e+00 : f32
    %71 = vector.broadcast %cst_26 : f32 to vector<8x32xf32>
    %72 = arith.subf %71, %64 : vector<8x32xf32>
    %73 = arith.mulf %72, %70 : vector<8x32xf32>
    %74 = arith.mulf %64, %47 : vector<8x32xf32>
    %75 = arith.addf %73, %74 : vector<8x32xf32>
    %cst_27 = arith.constant dense<0.000000e+00> : vector<8x96xf32>
    %76 = tpu.matmul %75, %0, %cst_27 {dimension_numbers = #tpu.dot_dimension_numbers<[1], [0], [0], [1], [0, 0, 1, 1], [], []>} : vector<8x32xf32>, vector<32x96xf32>, vector<8x96xf32> -> vector<8x96xf32>
    %77 = vector.extract_strided_slice %16 {offsets = [16, 0], sizes = [8, 32], strides = [1, 1]} : vector<64x32xf32> to vector<8x32xf32>
    %78 = vector.extract_strided_slice %76 {offsets = [0, 0], sizes = [8, 32], strides = [1, 1]} : vector<8x96xf32> to vector<8x32xf32>
    %79 = arith.addf %77, %78 : vector<8x32xf32>
    %80 = arith.negf %79 : vector<8x32xf32>
    %81 = math.exp %80 : vector<8x32xf32>
    %cst_28 = arith.constant 1.000000e+00 : f32
    %82 = vector.broadcast %cst_28 : f32 to vector<8x32xf32>
    %83 = arith.addf %82, %81 : vector<8x32xf32>
    %84 = arith.divf %82, %83 : vector<8x32xf32>
    %85 = vector.extract_strided_slice %17 {offsets = [16, 0], sizes = [8, 32], strides = [1, 1]} : vector<64x32xf32> to vector<8x32xf32>
    %86 = vector.extract_strided_slice %76 {offsets = [0, 32], sizes = [8, 32], strides = [1, 1]} : vector<8x96xf32> to vector<8x32xf32>
    %87 = arith.addf %85, %86 : vector<8x32xf32>
    %88 = arith.negf %87 : vector<8x32xf32>
    %89 = math.exp %88 : vector<8x32xf32>
    %cst_29 = arith.constant 1.000000e+00 : f32
    %90 = vector.broadcast %cst_29 : f32 to vector<8x32xf32>
    %91 = arith.addf %90, %89 : vector<8x32xf32>
    %92 = arith.divf %90, %91 : vector<8x32xf32>
    %93 = vector.extract_strided_slice %18 {offsets = [16, 0], sizes = [8, 32], strides = [1, 1]} : vector<64x32xf32> to vector<8x32xf32>
    %94 = vector.extract_strided_slice %76 {offsets = [0, 64], sizes = [8, 32], strides = [1, 1]} : vector<8x96xf32> to vector<8x32xf32>
    %95 = arith.addf %94, %3 : vector<8x32xf32>
    %96 = arith.mulf %84, %95 : vector<8x32xf32>
    %97 = arith.addf %93, %96 : vector<8x32xf32>
    %98 = math.tanh %97 : vector<8x32xf32>
    %cst_30 = arith.constant 1.000000e+00 : f32
    %99 = vector.broadcast %cst_30 : f32 to vector<8x32xf32>
    %100 = arith.subf %99, %92 : vector<8x32xf32>
    %101 = arith.mulf %100, %98 : vector<8x32xf32>
    %102 = arith.mulf %92, %75 : vector<8x32xf32>
    %103 = arith.addf %101, %102 : vector<8x32xf32>
    %cst_31 = arith.constant dense<0.000000e+00> : vector<8x96xf32>
    %104 = tpu.matmul %103, %0, %cst_31 {dimension_numbers = #tpu.dot_dimension_numbers<[1], [0], [0], [1], [0, 0, 1, 1], [], []>} : vector<8x32xf32>, vector<32x96xf32>, vector<8x96xf32> -> vector<8x96xf32>
    %105 = vector.extract_strided_slice %16 {offsets = [24, 0], sizes = [8, 32], strides = [1, 1]} : vector<64x32xf32> to vector<8x32xf32>
    %106 = vector.extract_strided_slice %104 {offsets = [0, 0], sizes = [8, 32], strides = [1, 1]} : vector<8x96xf32> to vector<8x32xf32>
    %107 = arith.addf %105, %106 : vector<8x32xf32>
    %108 = arith.negf %107 : vector<8x32xf32>
    %109 = math.exp %108 : vector<8x32xf32>
    %cst_32 = arith.constant 1.000000e+00 : f32
    %110 = vector.broadcast %cst_32 : f32 to vector<8x32xf32>
    %111 = arith.addf %110, %109 : vector<8x32xf32>
    %112 = arith.divf %110, %111 : vector<8x32xf32>
    %113 = vector.extract_strided_slice %17 {offsets = [24, 0], sizes = [8, 32], strides = [1, 1]} : vector<64x32xf32> to vector<8x32xf32>
    %114 = vector.extract_strided_slice %104 {offsets = [0, 32], sizes = [8, 32], strides = [1, 1]} : vector<8x96xf32> to vector<8x32xf32>
    %115 = arith.addf %113, %114 : vector<8x32xf32>
    %116 = arith.negf %115 : vector<8x32xf32>
    %117 = math.exp %116 : vector<8x32xf32>
    %cst_33 = arith.constant 1.000000e+00 : f32
    %118 = vector.broadcast %cst_33 : f32 to vector<8x32xf32>
    %119 = arith.addf %118, %117 : vector<8x32xf32>
    %120 = arith.divf %118, %119 : vector<8x32xf32>
    %121 = vector.extract_strided_slice %18 {offsets = [24, 0], sizes = [8, 32], strides = [1, 1]} : vector<64x32xf32> to vector<8x32xf32>
    %122 = vector.extract_strided_slice %104 {offsets = [0, 64], sizes = [8, 32], strides = [1, 1]} : vector<8x96xf32> to vector<8x32xf32>
    %123 = arith.addf %122, %3 : vector<8x32xf32>
    %124 = arith.mulf %112, %123 : vector<8x32xf32>
    %125 = arith.addf %121, %124 : vector<8x32xf32>
    %126 = math.tanh %125 : vector<8x32xf32>
    %cst_34 = arith.constant 1.000000e+00 : f32
    %127 = vector.broadcast %cst_34 : f32 to vector<8x32xf32>
    %128 = arith.subf %127, %120 : vector<8x32xf32>
    %129 = arith.mulf %128, %126 : vector<8x32xf32>
    %130 = arith.mulf %120, %103 : vector<8x32xf32>
    %131 = arith.addf %129, %130 : vector<8x32xf32>
    %cst_35 = arith.constant dense<0.000000e+00> : vector<8x96xf32>
    %132 = tpu.matmul %131, %0, %cst_35 {dimension_numbers = #tpu.dot_dimension_numbers<[1], [0], [0], [1], [0, 0, 1, 1], [], []>} : vector<8x32xf32>, vector<32x96xf32>, vector<8x96xf32> -> vector<8x96xf32>
    %133 = vector.extract_strided_slice %16 {offsets = [32, 0], sizes = [8, 32], strides = [1, 1]} : vector<64x32xf32> to vector<8x32xf32>
    %134 = vector.extract_strided_slice %132 {offsets = [0, 0], sizes = [8, 32], strides = [1, 1]} : vector<8x96xf32> to vector<8x32xf32>
    %135 = arith.addf %133, %134 : vector<8x32xf32>
    %136 = arith.negf %135 : vector<8x32xf32>
    %137 = math.exp %136 : vector<8x32xf32>
    %cst_36 = arith.constant 1.000000e+00 : f32
    %138 = vector.broadcast %cst_36 : f32 to vector<8x32xf32>
    %139 = arith.addf %138, %137 : vector<8x32xf32>
    %140 = arith.divf %138, %139 : vector<8x32xf32>
    %141 = vector.extract_strided_slice %17 {offsets = [32, 0], sizes = [8, 32], strides = [1, 1]} : vector<64x32xf32> to vector<8x32xf32>
    %142 = vector.extract_strided_slice %132 {offsets = [0, 32], sizes = [8, 32], strides = [1, 1]} : vector<8x96xf32> to vector<8x32xf32>
    %143 = arith.addf %141, %142 : vector<8x32xf32>
    %144 = arith.negf %143 : vector<8x32xf32>
    %145 = math.exp %144 : vector<8x32xf32>
    %cst_37 = arith.constant 1.000000e+00 : f32
    %146 = vector.broadcast %cst_37 : f32 to vector<8x32xf32>
    %147 = arith.addf %146, %145 : vector<8x32xf32>
    %148 = arith.divf %146, %147 : vector<8x32xf32>
    %149 = vector.extract_strided_slice %18 {offsets = [32, 0], sizes = [8, 32], strides = [1, 1]} : vector<64x32xf32> to vector<8x32xf32>
    %150 = vector.extract_strided_slice %132 {offsets = [0, 64], sizes = [8, 32], strides = [1, 1]} : vector<8x96xf32> to vector<8x32xf32>
    %151 = arith.addf %150, %3 : vector<8x32xf32>
    %152 = arith.mulf %140, %151 : vector<8x32xf32>
    %153 = arith.addf %149, %152 : vector<8x32xf32>
    %154 = math.tanh %153 : vector<8x32xf32>
    %cst_38 = arith.constant 1.000000e+00 : f32
    %155 = vector.broadcast %cst_38 : f32 to vector<8x32xf32>
    %156 = arith.subf %155, %148 : vector<8x32xf32>
    %157 = arith.mulf %156, %154 : vector<8x32xf32>
    %158 = arith.mulf %148, %131 : vector<8x32xf32>
    %159 = arith.addf %157, %158 : vector<8x32xf32>
    %cst_39 = arith.constant dense<0.000000e+00> : vector<8x96xf32>
    %160 = tpu.matmul %159, %0, %cst_39 {dimension_numbers = #tpu.dot_dimension_numbers<[1], [0], [0], [1], [0, 0, 1, 1], [], []>} : vector<8x32xf32>, vector<32x96xf32>, vector<8x96xf32> -> vector<8x96xf32>
    %161 = vector.extract_strided_slice %16 {offsets = [40, 0], sizes = [8, 32], strides = [1, 1]} : vector<64x32xf32> to vector<8x32xf32>
    %162 = vector.extract_strided_slice %160 {offsets = [0, 0], sizes = [8, 32], strides = [1, 1]} : vector<8x96xf32> to vector<8x32xf32>
    %163 = arith.addf %161, %162 : vector<8x32xf32>
    %164 = arith.negf %163 : vector<8x32xf32>
    %165 = math.exp %164 : vector<8x32xf32>
    %cst_40 = arith.constant 1.000000e+00 : f32
    %166 = vector.broadcast %cst_40 : f32 to vector<8x32xf32>
    %167 = arith.addf %166, %165 : vector<8x32xf32>
    %168 = arith.divf %166, %167 : vector<8x32xf32>
    %169 = vector.extract_strided_slice %17 {offsets = [40, 0], sizes = [8, 32], strides = [1, 1]} : vector<64x32xf32> to vector<8x32xf32>
    %170 = vector.extract_strided_slice %160 {offsets = [0, 32], sizes = [8, 32], strides = [1, 1]} : vector<8x96xf32> to vector<8x32xf32>
    %171 = arith.addf %169, %170 : vector<8x32xf32>
    %172 = arith.negf %171 : vector<8x32xf32>
    %173 = math.exp %172 : vector<8x32xf32>
    %cst_41 = arith.constant 1.000000e+00 : f32
    %174 = vector.broadcast %cst_41 : f32 to vector<8x32xf32>
    %175 = arith.addf %174, %173 : vector<8x32xf32>
    %176 = arith.divf %174, %175 : vector<8x32xf32>
    %177 = vector.extract_strided_slice %18 {offsets = [40, 0], sizes = [8, 32], strides = [1, 1]} : vector<64x32xf32> to vector<8x32xf32>
    %178 = vector.extract_strided_slice %160 {offsets = [0, 64], sizes = [8, 32], strides = [1, 1]} : vector<8x96xf32> to vector<8x32xf32>
    %179 = arith.addf %178, %3 : vector<8x32xf32>
    %180 = arith.mulf %168, %179 : vector<8x32xf32>
    %181 = arith.addf %177, %180 : vector<8x32xf32>
    %182 = math.tanh %181 : vector<8x32xf32>
    %cst_42 = arith.constant 1.000000e+00 : f32
    %183 = vector.broadcast %cst_42 : f32 to vector<8x32xf32>
    %184 = arith.subf %183, %176 : vector<8x32xf32>
    %185 = arith.mulf %184, %182 : vector<8x32xf32>
    %186 = arith.mulf %176, %159 : vector<8x32xf32>
    %187 = arith.addf %185, %186 : vector<8x32xf32>
    %cst_43 = arith.constant dense<0.000000e+00> : vector<8x96xf32>
    %188 = tpu.matmul %187, %0, %cst_43 {dimension_numbers = #tpu.dot_dimension_numbers<[1], [0], [0], [1], [0, 0, 1, 1], [], []>} : vector<8x32xf32>, vector<32x96xf32>, vector<8x96xf32> -> vector<8x96xf32>
    %189 = vector.extract_strided_slice %16 {offsets = [48, 0], sizes = [8, 32], strides = [1, 1]} : vector<64x32xf32> to vector<8x32xf32>
    %190 = vector.extract_strided_slice %188 {offsets = [0, 0], sizes = [8, 32], strides = [1, 1]} : vector<8x96xf32> to vector<8x32xf32>
    %191 = arith.addf %189, %190 : vector<8x32xf32>
    %192 = arith.negf %191 : vector<8x32xf32>
    %193 = math.exp %192 : vector<8x32xf32>
    %cst_44 = arith.constant 1.000000e+00 : f32
    %194 = vector.broadcast %cst_44 : f32 to vector<8x32xf32>
    %195 = arith.addf %194, %193 : vector<8x32xf32>
    %196 = arith.divf %194, %195 : vector<8x32xf32>
    %197 = vector.extract_strided_slice %17 {offsets = [48, 0], sizes = [8, 32], strides = [1, 1]} : vector<64x32xf32> to vector<8x32xf32>
    %198 = vector.extract_strided_slice %188 {offsets = [0, 32], sizes = [8, 32], strides = [1, 1]} : vector<8x96xf32> to vector<8x32xf32>
    %199 = arith.addf %197, %198 : vector<8x32xf32>
    %200 = arith.negf %199 : vector<8x32xf32>
    %201 = math.exp %200 : vector<8x32xf32>
    %cst_45 = arith.constant 1.000000e+00 : f32
    %202 = vector.broadcast %cst_45 : f32 to vector<8x32xf32>
    %203 = arith.addf %202, %201 : vector<8x32xf32>
    %204 = arith.divf %202, %203 : vector<8x32xf32>
    %205 = vector.extract_strided_slice %18 {offsets = [48, 0], sizes = [8, 32], strides = [1, 1]} : vector<64x32xf32> to vector<8x32xf32>
    %206 = vector.extract_strided_slice %188 {offsets = [0, 64], sizes = [8, 32], strides = [1, 1]} : vector<8x96xf32> to vector<8x32xf32>
    %207 = arith.addf %206, %3 : vector<8x32xf32>
    %208 = arith.mulf %196, %207 : vector<8x32xf32>
    %209 = arith.addf %205, %208 : vector<8x32xf32>
    %210 = math.tanh %209 : vector<8x32xf32>
    %cst_46 = arith.constant 1.000000e+00 : f32
    %211 = vector.broadcast %cst_46 : f32 to vector<8x32xf32>
    %212 = arith.subf %211, %204 : vector<8x32xf32>
    %213 = arith.mulf %212, %210 : vector<8x32xf32>
    %214 = arith.mulf %204, %187 : vector<8x32xf32>
    %215 = arith.addf %213, %214 : vector<8x32xf32>
    %cst_47 = arith.constant dense<0.000000e+00> : vector<8x96xf32>
    %216 = tpu.matmul %215, %0, %cst_47 {dimension_numbers = #tpu.dot_dimension_numbers<[1], [0], [0], [1], [0, 0, 1, 1], [], []>} : vector<8x32xf32>, vector<32x96xf32>, vector<8x96xf32> -> vector<8x96xf32>
    %217 = vector.extract_strided_slice %16 {offsets = [56, 0], sizes = [8, 32], strides = [1, 1]} : vector<64x32xf32> to vector<8x32xf32>
    %218 = vector.extract_strided_slice %216 {offsets = [0, 0], sizes = [8, 32], strides = [1, 1]} : vector<8x96xf32> to vector<8x32xf32>
    %219 = arith.addf %217, %218 : vector<8x32xf32>
    %220 = arith.negf %219 : vector<8x32xf32>
    %221 = math.exp %220 : vector<8x32xf32>
    %cst_48 = arith.constant 1.000000e+00 : f32
    %222 = vector.broadcast %cst_48 : f32 to vector<8x32xf32>
    %223 = arith.addf %222, %221 : vector<8x32xf32>
    %224 = arith.divf %222, %223 : vector<8x32xf32>
    %225 = vector.extract_strided_slice %17 {offsets = [56, 0], sizes = [8, 32], strides = [1, 1]} : vector<64x32xf32> to vector<8x32xf32>
    %226 = vector.extract_strided_slice %216 {offsets = [0, 32], sizes = [8, 32], strides = [1, 1]} : vector<8x96xf32> to vector<8x32xf32>
    %227 = arith.addf %225, %226 : vector<8x32xf32>
    %228 = arith.negf %227 : vector<8x32xf32>
    %229 = math.exp %228 : vector<8x32xf32>
    %cst_49 = arith.constant 1.000000e+00 : f32
    %230 = vector.broadcast %cst_49 : f32 to vector<8x32xf32>
    %231 = arith.addf %230, %229 : vector<8x32xf32>
    %232 = arith.divf %230, %231 : vector<8x32xf32>
    %233 = vector.extract_strided_slice %18 {offsets = [56, 0], sizes = [8, 32], strides = [1, 1]} : vector<64x32xf32> to vector<8x32xf32>
    %234 = vector.extract_strided_slice %216 {offsets = [0, 64], sizes = [8, 32], strides = [1, 1]} : vector<8x96xf32> to vector<8x32xf32>
    %235 = arith.addf %234, %3 : vector<8x32xf32>
    %236 = arith.mulf %224, %235 : vector<8x32xf32>
    %237 = arith.addf %233, %236 : vector<8x32xf32>
    %238 = math.tanh %237 : vector<8x32xf32>
    %cst_50 = arith.constant 1.000000e+00 : f32
    %239 = vector.broadcast %cst_50 : f32 to vector<8x32xf32>
    %240 = arith.subf %239, %232 : vector<8x32xf32>
    %241 = arith.mulf %240, %238 : vector<8x32xf32>
    %242 = arith.mulf %232, %215 : vector<8x32xf32>
    %243 = arith.addf %241, %242 : vector<8x32xf32>
    %c0_51 = arith.constant 0 : index
    %c0_52 = arith.constant 0 : index
    %244 = vector.load %arg1[%c0_51, %c0_52] : memref<64x32xf32, #tpu.memory_space<vmem>>, vector<64x32xf32>
    %cst_53 = arith.constant dense<0.000000e+00> : vector<64x32xf32>
    %245 = tpu.matmul %244, %11, %cst_53 {dimension_numbers = #tpu.dot_dimension_numbers<[1], [0], [0], [1], [0, 0, 1, 1], [], []>} : vector<64x32xf32>, vector<32x32xf32>, vector<64x32xf32> -> vector<64x32xf32>
    %246 = vector.broadcast %4 : vector<1x32xf32> to vector<64x32xf32>
    %247 = arith.addf %245, %246 : vector<64x32xf32>
    %cst_54 = arith.constant 0.000000e+00 : f32
    %248 = vector.broadcast %cst_54 : f32 to vector<64x32xf32>
    %249 = arith.maximumf %247, %248 : vector<64x32xf32>
    %cst_55 = arith.constant dense<0.000000e+00> : vector<8x32xf32>
    %250 = tpu.matmul %243, %12, %cst_55 {dimension_numbers = #tpu.dot_dimension_numbers<[1], [0], [0], [1], [0, 0, 1, 1], [], []>} : vector<8x32xf32>, vector<32x32xf32>, vector<8x32xf32> -> vector<8x32xf32>
    %251 = vector.broadcast %5 : vector<1x32xf32> to vector<8x32xf32>
    %252 = arith.addf %250, %251 : vector<8x32xf32>
    %cst_56 = arith.constant 0.000000e+00 : f32
    %253 = vector.broadcast %cst_56 : f32 to vector<8x32xf32>
    %254 = arith.maximumf %252, %253 : vector<8x32xf32>
    %255 = vector.broadcast %6 : vector<1x32xf32> to vector<8x32xf32>
    %256 = arith.mulf %254, %255 : vector<8x32xf32>
    %257 = vector.shape_cast %249 : vector<64x32xf32> to vector<8x8x32xf32>
    %258 = vector.shape_cast %256 : vector<8x32xf32> to vector<8x1x32xf32>
    %259 = vector.broadcast %258 : vector<8x1x32xf32> to vector<8x8x32xf32>
    %260 = arith.mulf %257, %259 : vector<8x8x32xf32>
    %cst_57 = arith.constant dense<0.000000e+00> : vector<8x8xf32>
    %261 = vector.multi_reduction <add>, %260, %cst_57 [2] : vector<8x8x32xf32> to vector<8x8xf32>
    %262 = vector.broadcast %7 : vector<1x1xf32> to vector<8x8xf32>
    %263 = arith.addf %261, %262 : vector<8x8xf32>
    %cst_58 = arith.constant dense<0xFF800000> : vector<8xf32>
    %264 = vector.multi_reduction <maximumf>, %263, %cst_58 [1] : vector<8x8xf32> to vector<8xf32>
    %265 = vector.shape_cast %264 : vector<8xf32> to vector<8x1xf32>
    %266 = vector.broadcast %265 : vector<8x1xf32> to vector<8x8xf32>
    %267 = arith.subf %263, %266 : vector<8x8xf32>
    %268 = math.exp %267 : vector<8x8xf32>
    %cst_59 = arith.constant dense<0.000000e+00> : vector<8xf32>
    %269 = vector.multi_reduction <add>, %268, %cst_59 [1] : vector<8x8xf32> to vector<8xf32>
    %270 = vector.shape_cast %269 : vector<8xf32> to vector<8x1xf32>
    %271 = vector.broadcast %270 : vector<8x1xf32> to vector<8x8xf32>
    %272 = arith.divf %268, %271 : vector<8x8xf32>
    %273 = vector.shape_cast %272 : vector<8x8xf32> to vector<8x8x1xf32>
    %274 = vector.shape_cast %244 : vector<64x32xf32> to vector<8x8x32xf32>
    %275 = vector.broadcast %273 : vector<8x8x1xf32> to vector<8x8x32xf32>
    %276 = arith.mulf %275, %274 : vector<8x8x32xf32>
    %cst_60 = arith.constant dense<0.000000e+00> : vector<8x32xf32>
    %277 = vector.multi_reduction <add>, %276, %cst_60 [1] : vector<8x8x32xf32> to vector<8x32xf32>
    %278 = tpu.concatenate %243, %277 in 1 : vector<8x32xf32>, vector<8x32xf32> -> vector<8x64xf32>
    %cst_61 = arith.constant dense<0.000000e+00> : vector<8x64xf32>
    %279 = tpu.matmul %278, %14, %cst_61 {dimension_numbers = #tpu.dot_dimension_numbers<[1], [0], [0], [1], [0, 0, 1, 1], [], []>} : vector<8x64xf32>, vector<64x64xf32>, vector<8x64xf32> -> vector<8x64xf32>
    %280 = vector.broadcast %8 : vector<1x64xf32> to vector<8x64xf32>
    %281 = arith.addf %279, %280 : vector<8x64xf32>
    %cst_62 = arith.constant 0.000000e+00 : f32
    %282 = vector.broadcast %cst_62 : f32 to vector<8x64xf32>
    %283 = arith.maximumf %281, %282 : vector<8x64xf32>
    %284 = vector.extract_strided_slice %283 {offsets = [0, 0], sizes = [8, 32], strides = [1, 1]} : vector<8x64xf32> to vector<8x32xf32>
    %285 = vector.extract_strided_slice %283 {offsets = [0, 32], sizes = [8, 32], strides = [1, 1]} : vector<8x64xf32> to vector<8x32xf32>
    %286 = arith.mulf %284, %285 : vector<8x32xf32>
    %cst_63 = arith.constant dense<0.000000e+00> : vector<8x64xf32>
    %287 = tpu.matmul %286, %13, %cst_63 {dimension_numbers = #tpu.dot_dimension_numbers<[1], [0], [0], [1], [0, 0, 1, 1], [], []>} : vector<8x32xf32>, vector<32x64xf32>, vector<8x64xf32> -> vector<8x64xf32>
    %288 = vector.broadcast %9 : vector<1x64xf32> to vector<8x64xf32>
    %289 = arith.addf %287, %288 : vector<8x64xf32>
    %cst_64 = arith.constant 0.000000e+00 : f32
    %290 = vector.broadcast %cst_64 : f32 to vector<8x64xf32>
    %291 = arith.maximumf %289, %290 : vector<8x64xf32>
    %cst_65 = arith.constant dense<0.000000e+00> : vector<8x128xf32>
    %292 = tpu.matmul %291, %15, %cst_65 {dimension_numbers = #tpu.dot_dimension_numbers<[1], [0], [0], [1], [0, 0, 1, 1], [], []>} : vector<8x64xf32>, vector<64x128xf32>, vector<8x128xf32> -> vector<8x128xf32>
    %293 = vector.broadcast %10 : vector<1x128xf32> to vector<8x128xf32>
    %294 = arith.addf %292, %293 : vector<8x128xf32>
    %c0_66 = arith.constant 0 : index
    %c0_67 = arith.constant 0 : index
    %295 = vector.load %arg3[%c0_66, %c0_67] : memref<8x128xf32, #tpu.memory_space<vmem>>, vector<8x128xf32>
    tpu.vector_store %arg3[%c0_66, %c0_67], %294 {strides = array<i32>} : memref<8x128xf32, #tpu.memory_space<vmem>>, vector<8x128xf32>,
    return
  }
}

</mosaic_0001>

<bundles_post_ra>
// kernel: base_model_forward.1
= control target key start
LH: loop header
LB: loop body
LE: loop exit
PB: predicated region body
PF: predicated region fallthrough
CT: control target
= control target key end

     0   :  { %v2345_v0 = vmov 0.0|0.0   ;;  %vm2346_vm0 = vmmov 0   ;;  %v2347_v4 = vmov 0.0   ;;  %s2348_s22 = smov 64   ;;  %s2349_s25 = smov 96   ;;  %vm66_vm1 = vcmask 261120   ;;  %s2864_s2 = inlined_call_operand.vmem [shape: f32[264,128], index: 2, kind: input, shape index: {}]   ;;  %s2865_s0 = inlined_call_operand.vmem [shape: f32[64,128], index: 0, kind: input, shape index: {}]   ;;  %s2866_s1 = inlined_call_operand.vmem [shape: f32[64,32], index: 1, kind: input, shape index: {}]   ;;  %s2867_s3 = inlined_call_operand.vmem [shape: f32[8,128], index: 3, kind: output, shape index: {}]  }
   0x1   :  { %2161 = vmatprep.subr.bf16.mxu0 %v2345_v0  ;;  %v14_v1 = vld [vmem:[%s2864_s2] sm:$0xff]  ;;  %v15_v2 = vld [vmem:[%s2864_s2 + $0x8] sm:$0xff]  ;;  %v16_v3 = vld [vmem:[%s2864_s2 + $0x10] sm:$0xff]  ;;  %2001 = vmatprep.mubr.msk.f32.mxu0 %vm2346_vm0, %v2347_v4  ;;  %vm1295_vm2 = vcmask 1041409   ;;  %vm1297_vm3 = vcmask 1042434   ;;  %vm1299_vm4 = vcmask 1043459  }
   0x2   :  { %v2385_v5 = vpack.c.bf16 %v15_v2, %v14_v1  ;;  %v17_v6 = vld [vmem:[%s2864_s2 + $0x18] sm:$0xff]  ;;  %v1879_v7 = vld [vmem:[%s2864_s2 + $0x20] ss:$0 sm:$0xff]  ;;  %2167 = vmatprep.subr.bf16.mxu1 %v2345_v0  ;;  %2012 = vmatprep.mubr.msk.f32.mxu1 %vm2346_vm0, %v2347_v4  ;;  %v59_v33 = vld [vmem:[%s2865_s0 + $0x8] sm:$0xff]  ;;  %vm1301_vm5 = vcmask 1044484   ;;  %vm1303_vm6 = vcmask 1045509  }
   0x3   :  { %148 = vrot.lane.b32.xlu0 %v1879_v7, %s2348_s22  ;;  %v2398_v8 = vpack.c.bf16 %v17_v6, %v16_v3  ;;  %v58_v13 = vld [vmem:[%s2865_s0] sm:$0xff]  ;;  %v60_v53 = vld [vmem:[%s2865_s0 + $0x10] sm:$0xff]  ;;  %vm1305_vm7 = vcmask 1046534   ;;  %vm1307_vm8 = vcmask 1047559   ;;  %vm1310_vm9 = vcmask 64512   ;;  %s2352_s15 = smov 32  }
   0x4   :  { %2163 = vmatpush3.bf16.msra.mxu0 %v2385_v5  ;;  %2169 = vmatpush3.bf16.msra.mxu1 %v2385_v5  ;;  %vm1639_vm10 = vcmask 523264  }
   0x5   :  { %2164 = vmatprep.subr.bf16.mxu0 %v2345_v0  ;;  %2170 = vmatprep.subr.bf16.mxu1 %v2345_v0 }
   0x8   :  { %2166 = vmatpush3.bf16.msra.mxu0 %v2398_v8  ;;  %2172 = vmatpush3.bf16.msra.mxu1 %v2398_v8 }
   0x9   :  { %2173 = vmatprep.subr.bf16.mxu0 %v2345_v0  ;;  %2179 = vmatprep.subr.bf16.mxu1 %v2345_v0 }
   0xb   :  { %2002 = vmatmul.mubr.f32.vlgmr.msra.gmra.mrb[0].mxu0 %v2347_v4 }
   0xc   :  { %2175 = vmatpush3.bf16.msra.mxu0 %v2385_v5  ;;  %2023 = vmatprep.mubr.msk.f32.mxu0 %vm2346_vm0, %v2347_v4 }
   0xd   :  { %2176 = vmatprep.subr.bf16.mxu0 %v2345_v0 }
  0x10   :  { %2178 = vmatpush3.bf16.msra.mxu0 %v2398_v8 }
  0x11   :  { %2185 = vmatprep.subr.bf16.mxu0 %v2345_v0 }
  0x75   :  { %v2414_v9 = vpop.permute.xlu0 %148 }
  0xde   :  { %v136_v10 = vpop.f32.mrb[0].mxu0 }
  0xdf   :  { %v151_v11 = vadd.f32 %v2414_v9, %v136_v10  ;;  %v2003_v12 = vpop.f32.mrb[1].mxu0  ;;  %v140_v14 = vadd.f32 %v136_v10, %v58_v13 }
  0xe1   :  { %153 = vrot.lane.b32.xlu0 %v151_v11, %s2348_s22  ;;  %v1880_v15 = vmul.f32 -1.442695, %v140_v14  ;;  %v61_v14 = vld [vmem:[%s2865_s0 + $0x18] sm:$0xff] }
  0xe3   :  { %2265 = vpow2.f32 %v1880_v15 }
  0xed   :  { %v2266_v16 = vpop.eup %2265 }
  0xee   :  { %v144_v17 = vadd.f32 1.0, %v2266_v16 }
  0xf0   :  { %2267 = vrcp.f32 %v144_v17 }
  0xfa   :  { %v2268_v18 = vpop.eup %2267 }
  0xfb   :  { %v163_v24 = vsub.f32 1.0, %v2268_v18  ;;  %v169_v26 = vmul.f32 0.0, %v2268_v18 }
 0x153   :  { %v154_v19 = vpop.permute.xlu0 %153 }
 0x154   :  { %v156_v20 = vmul.f32 %v2268_v18, %v154_v19 }
 0x156   :  { %158 = vrot.lane.b32.xlu1 %v156_v20, %s2348_s22 }
 0x1c8   :  { %v159_v21 = vpop.permute.xlu1 %158 }
 0x1c9   :  { %v161_v22 = vadd.f32 %v159_v21, %v58_v13 }
 0x1cb   :  { %2269 = vtanh.f32 %v161_v22 }
 0x1d5   :  { %v2270_v23 = vpop.eup %2269 }
 0x1d6   :  { %165 = vrot.lane.b32.xlu1 %v2270_v23, %s2349_s25 }
 0x248   :  { %v166_v25 = vpop.permute.xlu1 %165 }
 0x249   :  { %v168_v27 = vmul.f32 %v166_v25, %v163_v24 }
 0x24b   :  { %v170_v28 = vadd.f32 %v169_v26, %v168_v27 }
 0x24d   :  { %172 = vrot.lane.b32.xlu0 %v170_v28, %s2349_s25 }
 0x2bf   :  { %v173_v29 = vpop.permute.xlu0 %172 }
 0x2c0   :  { %2013 = vmatmul.mubr.msk.f32.vlgmr.msra.gmra.mrb[0].mxu1 %vm66_vm1, %v173_v29 }
 0x2c1   :  { %2181 = vmatpush3.bf16.msra.mxu1 %v2385_v5  ;;  %2034 = vmatprep.mubr.msk.f32.mxu1 %vm2346_vm0, %v2347_v4 }
 0x2c2   :  { %2182 = vmatprep.subr.bf16.mxu1 %v2345_v0 }
 0x2c5   :  { %2184 = vmatpush3.bf16.msra.mxu1 %v2398_v8 }
 0x2c6   :  { %2191 = vmatprep.subr.bf16.mxu1 %v2345_v0 }
 0x393   :  { %v242_v30 = vpop.f32.mrb[0].mxu1 }
 0x394   :  { %v253_v31 = vadd.f32 %v242_v30, %v2414_v9  ;;  %v2014_v32 = vpop.f32.mrb[1].mxu1  ;;  %v246_v34 = vadd.f32 %v242_v30, %v59_v33 }
 0x396   :  { %255 = vrot.lane.b32.xlu1 %v253_v31, %s2348_s22  ;;  %v1882_v35 = vmul.f32 -1.442695, %v246_v34  ;;  %v62_v34 = vld [vmem:[%s2865_s0 + $0x20] sm:$0xff] }
 0x398   :  { %2271 = vpow2.f32 %v1882_v35 }
 0x3a2   :  { %v2272_v36 = vpop.eup %2271 }
 0x3a3   :  { %v250_v37 = vadd.f32 1.0, %v2272_v36 }
 0x3a5   :  { %2273 = vrcp.f32 %v250_v37 }
 0x3af   :  { %v2274_v38 = vpop.eup %2273 }
 0x3b0   :  { %v265_v44 = vsub.f32 1.0, %v2274_v38  ;;  %v271_v46 = vmul.f32 %v2274_v38, %v170_v28 }
 0x408   :  { %v256_v39 = vpop.permute.xlu1 %255 }
 0x409   :  { %v258_v40 = vmul.f32 %v2274_v38, %v256_v39 }
 0x40b   :  { %260 = vrot.lane.b32.xlu0 %v258_v40, %s2348_s22 }
 0x47d   :  { %v261_v41 = vpop.permute.xlu0 %260 }
 0x47e   :  { %v263_v42 = vadd.f32 %v261_v41, %v59_v33 }
 0x480   :  { %2275 = vtanh.f32 %v263_v42 }
 0x48a   :  { %v2276_v43 = vpop.eup %2275 }
 0x48b   :  { %267 = vrot.lane.b32.xlu1 %v2276_v43, %s2349_s25 }
 0x4fd   :  { %v268_v45 = vpop.permute.xlu1 %267 }
 0x4fe   :  { %v270_v47 = vmul.f32 %v268_v45, %v265_v44 }
 0x500   :  { %v272_v48 = vadd.f32 %v271_v46, %v270_v47 }
 0x502   :  { %274 = vrot.lane.b32.xlu0 %v272_v48, %s2349_s25 }
 0x574   :  { %v275_v49 = vpop.permute.xlu0 %274 }
 0x575   :  { %2024 = vmatmul.mubr.msk.f32.vlgmr.msra.gmra.mrb[2].mxu0 %vm66_vm1, %v275_v49 }
 0x576   :  { %2187 = vmatpush3.bf16.msra.mxu0 %v2385_v5  ;;  %2045 = vmatprep.mubr.msk.f32.mxu0 %vm2346_vm0, %v2347_v4 }
 0x577   :  { %2188 = vmatprep.subr.bf16.mxu0 %v2345_v0 }
 0x57a   :  { %2190 = vmatpush3.bf16.msra.mxu0 %v2398_v8 }
 0x57b   :  { %2197 = vmatprep.subr.bf16.mxu0 %v2345_v0 }
 0x648   :  { %v344_v50 = vpop.f32.mrb[2].mxu0 }
 0x649   :  { %v355_v51 = vadd.f32 %v344_v50, %v2414_v9  ;;  %v2025_v52 = vpop.f32.mrb[3].mxu0  ;;  %v348_v54 = vadd.f32 %v344_v50, %v60_v53 }
 0x64b   :  { %357 = vrot.lane.b32.xlu1 %v355_v51, %s2348_s22  ;;  %v1884_v55 = vmul.f32 -1.442695, %v348_v54  ;;  %v63_v54 = vld [vmem:[%s2865_s0 + $0x28] sm:$0xff] }
 0x64d   :  { %2277 = vpow2.f32 %v1884_v55 }
 0x657   :  { %v2278_v56 = vpop.eup %2277 }
 0x658   :  { %v352_v57 = vadd.f32 1.0, %v2278_v56 }
 0x65a   :  { %2279 = vrcp.f32 %v352_v57 }
 0x664   :  { %v2280_v58 = vpop.eup %2279 }
 0x665   :  { %v367_v1 = vsub.f32 1.0, %v2280_v58  ;;  %v373_v3 = vmul.f32 %v2280_v58, %v272_v48 }
 0x6bd   :  { %v358_v59 = vpop.permute.xlu1 %357 }
 0x6be   :  { %v360_v60 = vmul.f32 %v2280_v58, %v358_v59 }
 0x6c0   :  { %362 = vrot.lane.b32.xlu0 %v360_v60, %s2348_s22 }
 0x732   :  { %v363_v61 = vpop.permute.xlu0 %362 }
 0x733   :  { %v365_v62 = vadd.f32 %v363_v61, %v60_v53 }
 0x735   :  { %2281 = vtanh.f32 %v365_v62 }
 0x73f   :  { %v2282_v63 = vpop.eup %2281 }
 0x740   :  { %369 = vrot.lane.b32.xlu1 %v2282_v63, %s2349_s25 }
 0x7b2   :  { %v370_v2 = vpop.permute.xlu1 %369 }
 0x7b3   :  { %v372_v6 = vmul.f32 %v370_v2, %v367_v1 }
 0x7b5   :  { %v374_v7 = vadd.f32 %v373_v3, %v372_v6 }
 0x7b7   :  { %376 = vrot.lane.b32.xlu0 %v374_v7, %s2349_s25 }
 0x829   :  { %v377_v10 = vpop.permute.xlu0 %376 }
 0x82a   :  { %2035 = vmatmul.mubr.msk.f32.vlgmr.msra.gmra.mrb[2].mxu1 %vm66_vm1, %v377_v10 }
 0x82b   :  { %2193 = vmatpush3.bf16.msra.mxu1 %v2385_v5  ;;  %2056 = vmatprep.mubr.msk.f32.mxu1 %vm2346_vm0, %v2347_v4 }
 0x82c   :  { %2194 = vmatprep.subr.bf16.mxu1 %v2345_v0 }
 0x82f   :  { %2196 = vmatpush3.bf16.msra.mxu1 %v2398_v8 }
 0x830   :  { %2203 = vmatprep.subr.bf16.mxu1 %v2345_v0 }
 0x8fd   :  { %v446_v11 = vpop.f32.mrb[2].mxu1 }
 0x8fe   :  { %v457_v12 = vadd.f32 %v446_v11, %v2414_v9  ;;  %v2036_v13 = vpop.f32.mrb[3].mxu1  ;;  %v450_v15 = vadd.f32 %v446_v11, %v61_v14 }
 0x8ff   :  { %v64_v13 = vld [vmem:[%s2865_s0 + $0x30] sm:$0xff] }
 0x900   :  { %459 = vrot.lane.b32.xlu1 %v457_v12, %s2348_s22  ;;  %v1886_v16 = vmul.f32 -1.442695, %v450_v15 }
 0x902   :  { %2283 = vpow2.f32 %v1886_v16 }
 0x90c   :  { %v2284_v17 = vpop.eup %2283 }
 0x90d   :  { %v454_v18 = vadd.f32 1.0, %v2284_v17 }
 0x90f   :  { %2285 = vrcp.f32 %v454_v18 }
 0x919   :  { %v2286_v19 = vpop.eup %2285 }
 0x91a   :  { %v469_v25 = vsub.f32 1.0, %v2286_v19  ;;  %v475_v27 = vmul.f32 %v2286_v19, %v374_v7 }
 0x972   :  { %v460_v20 = vpop.permute.xlu1 %459 }
 0x973   :  { %v462_v21 = vmul.f32 %v2286_v19, %v460_v20 }
 0x975   :  { %464 = vrot.lane.b32.xlu0 %v462_v21, %s2348_s22 }
 0x9e7   :  { %v465_v22 = vpop.permute.xlu0 %464 }
 0x9e8   :  { %v467_v23 = vadd.f32 %v465_v22, %v61_v14 }
 0x9ea   :  { %2287 = vtanh.f32 %v467_v23 }
 0x9f4   :  { %v2288_v24 = vpop.eup %2287 }
 0x9f5   :  { %471 = vrot.lane.b32.xlu1 %v2288_v24, %s2349_s25 }
 0xa67   :  { %v472_v26 = vpop.permute.xlu1 %471 }
 0xa68   :  { %v474_v28 = vmul.f32 %v472_v26, %v469_v25 }
 0xa6a   :  { %v476_v29 = vadd.f32 %v475_v27, %v474_v28 }
 0xa6c   :  { %478 = vrot.lane.b32.xlu0 %v476_v29, %s2349_s25 }
 0xade   :  { %v479_v30 = vpop.permute.xlu0 %478 }
 0xadf   :  { %2046 = vmatmul.mubr.msk.f32.vlgmr.msra.gmra.mrb[4].mxu0 %vm66_vm1, %v479_v30 }
 0xae0   :  { %2199 = vmatpush3.bf16.msra.mxu0 %v2385_v5  ;;  %2067 = vmatprep.mubr.msk.f32.mxu0 %vm2346_vm0, %v2347_v4 }
 0xae1   :  { %2200 = vmatprep.subr.bf16.mxu0 %v2345_v0 }
 0xae4   :  { %2202 = vmatpush3.bf16.msra.mxu0 %v2398_v8 }
 0xbb2   :  { %v548_v31 = vpop.f32.mrb[4].mxu0 }
 0xbb3   :  { %v559_v32 = vadd.f32 %v548_v31, %v2414_v9  ;;  %v2047_v33 = vpop.f32.mrb[5].mxu0  ;;  %v552_v35 = vadd.f32 %v548_v31, %v62_v34 }
 0xbb4   :  { %v65_v33 = vld [vmem:[%s2865_s0 + $0x38] sm:$0xff] }
 0xbb5   :  { %561 = vrot.lane.b32.xlu1 %v559_v32, %s2348_s22  ;;  %v1888_v36 = vmul.f32 -1.442695, %v552_v35 }
 0xbb7   :  { %2289 = vpow2.f32 %v1888_v36 }
 0xbc1   :  { %v2290_v37 = vpop.eup %2289 }
 0xbc2   :  { %v556_v38 = vadd.f32 1.0, %v2290_v37 }
 0xbc4   :  { %2291 = vrcp.f32 %v556_v38 }
 0xbce   :  { %v2292_v39 = vpop.eup %2291 }
 0xbcf   :  { %v571_v45 = vsub.f32 1.0, %v2292_v39  ;;  %v577_v47 = vmul.f32 %v2292_v39, %v476_v29 }
 0xc27   :  { %v562_v40 = vpop.permute.xlu1 %561 }
 0xc28   :  { %v564_v41 = vmul.f32 %v2292_v39, %v562_v40 }
 0xc2a   :  { %566 = vrot.lane.b32.xlu0 %v564_v41, %s2348_s22 }
 0xc9c   :  { %v567_v42 = vpop.permute.xlu0 %566 }
 0xc9d   :  { %v569_v43 = vadd.f32 %v567_v42, %v62_v34  ;;  %v30_v42 = vld [vmem:[%s2864_s2 + $0x28] sm:$0xff] }
 0xc9f   :  { %2293 = vtanh.f32 %v569_v43  ;;  %v31_v43 = vld [vmem:[%s2864_s2 + $0x30] sm:$0xff] }
 0xca9   :  { %v2294_v44 = vpop.eup %2293 }
 0xcaa   :  { %573 = vrot.lane.b32.xlu1 %v2294_v44, %s2349_s25  ;;  %v34_v44 = vld [vmem:[%s2864_s2 + $0x48] sm:$0xff] }
 0xd1c   :  { %v574_v46 = vpop.permute.xlu1 %573 }
 0xd1d   :  { %v576_v48 = vmul.f32 %v574_v46, %v571_v45  ;;  %v2209_v45 = vpack.c.bf16 %v31_v43, %v30_v42  ;;  %v35_v46 = vld [vmem:[%s2864_s2 + $0x50] sm:$0xff] }
 0xd1f   :  { %v578_v49 = vadd.f32 %v577_v47, %v576_v48  ;;  %v32_v47 = vld [vmem:[%s2864_s2 + $0x38] sm:$0xff]  ;;  %v33_v48 = vld [vmem:[%s2864_s2 + $0x40] sm:$0xff]  ;;  %2210 = vmatprep.subr.bf16.mxu0 %v2209_v45 }
 0xd21   :  { %580 = vrot.lane.b32.xlu0 %v578_v49, %s2349_s25 }
 0xd93   :  { %v581_v50 = vpop.permute.xlu0 %580 }
 0xd94   :  { %2057 = vmatmul.mubr.msk.f32.vlgmr.msra.gmra.mrb[4].mxu1 %vm66_vm1, %v581_v50  ;;  %v2213_v50 = vpack.c.bf16 %v33_v48, %v32_v47 }
 0xd95   :  { %2205 = vmatpush3.bf16.msra.mxu1 %v2385_v5  ;;  %2078 = vmatprep.mubr.msk.f32.mxu1 %vm2346_vm0, %v2347_v4 }
 0xd96   :  { %2206 = vmatprep.subr.bf16.mxu1 %v2345_v0 }
 0xd99   :  { %2208 = vmatpush3.bf16.msra.mxu1 %v2398_v8 }
 0xd9a   :  { %2217 = vmatprep.subr.bf16.mxu1 %v2345_v0 }
 0xe67   :  { %v650_v51 = vpop.f32.mrb[4].mxu1 }
 0xe68   :  { %v661_v52 = vadd.f32 %v650_v51, %v2414_v9  ;;  %v2058_v53 = vpop.f32.mrb[5].mxu1  ;;  %v654_v5 = vadd.f32 %v650_v51, %v63_v54  ;;  %v36_v51 = vld [vmem:[%s2864_s2 + $0x58] sm:$0xff] }
 0xe69   :  { %v2546_v53 = vld [vmem:[%s2866_s1] sm:$0xff] }
 0xe6a   :  { %663 = vrot.lane.b32.xlu1 %v661_v52, %s2348_s22  ;;  %v1890_v55 = vmul.f32 -1.442695, %v654_v5  ;;  %v37_v52 = vld [vmem:[%s2864_s2 + $0x60] sm:$0xff] }
 0xe6c   :  { %2295 = vpow2.f32 %v1890_v55  ;;  %v2554_v55 = vld [vmem:[%s2866_s1 + $0x8] sm:$0xff] }
 0xe76   :  { %v2296_v56 = vpop.eup %2295 }
 0xe77   :  { %v658_v57 = vadd.f32 1.0, %v2296_v56  ;;  %v2564_v56 = vld [vmem:[%s2866_s1 + $0x10] sm:$0xff] }
 0xe79   :  { %2297 = vrcp.f32 %v658_v57  ;;  %v2569_v57 = vld [vmem:[%s2866_s1 + $0x18] sm:$0xff] }
 0xe83   :  { %v2298_v58 = vpop.eup %2297 }
 0xe84   :  { %v673_v63 = vsub.f32 1.0, %v2298_v58  ;;  %v679_v2 = vmul.f32 %v2298_v58, %v578_v49  ;;  %v2218_v49 = vpack.c.bf16 %v35_v46, %v34_v44 }
 0xedc   :  { %v664_v8 = vpop.permute.xlu1 %663 }
 0xedd   :  { %v666_v59 = vmul.f32 %v2298_v58, %v664_v8  ;;  %v2574_v58 = vld [vmem:[%s2866_s1 + $0x20] sm:$0xff]  ;;  %v2585_v8 = vld [vmem:[%s2866_s1 + $0x28] sm:$0xff] }
 0xedf   :  { %668 = vrot.lane.b32.xlu0 %v666_v59, %s2348_s22  ;;  %v2590_v59 = vld [vmem:[%s2866_s1 + $0x30] sm:$0xff] }
 0xf51   :  { %v669_v60 = vpop.permute.xlu0 %668 }
 0xf52   :  { %v671_v61 = vadd.f32 %v669_v60, %v63_v54  ;;  %v2221_v54 = vpack.c.bf16 %v37_v52, %v36_v51 }
 0xf54   :  { %2299 = vtanh.f32 %v671_v61  ;;  %v2599_v61 = vld [vmem:[%s2866_s1 + $0x38] sm:$0xff] }
 0xf5e   :  { %v2300_v62 = vpop.eup %2299 }
 0xf5f   :  { %675 = vrot.lane.b32.xlu1 %v2300_v62, %s2349_s25 }
 0xfd1   :  { %v676_v1 = vpop.permute.xlu1 %675 }
 0xfd2   :  { %v678_v3 = vmul.f32 %v676_v1, %v673_v63 }
 0xfd4   :  { %v680_v6 = vadd.f32 %v679_v2, %v678_v3 }
 0xfd6   :  { %682 = vrot.lane.b32.xlu0 %v680_v6, %s2349_s25 }
0x1048   :  { %v683_v7 = vpop.permute.xlu0 %682 }
0x1049   :  { %2068 = vmatmul.mubr.msk.f32.vlgmr.msra.gmra.mrb[6].mxu0 %vm66_vm1, %v683_v7 }
0x104a   :  { %2089 = vmatprep.mubr.msk.f32.mxu0 %vm66_vm1, %v2546_v53  ;;  %2212 = vmatpush3.bf16.msra.mxu0 %v2209_v45 }
0x104b   :  { %2214 = vmatprep.subr.bf16.mxu0 %v2213_v50 }
0x104e   :  { %2216 = vmatpush3.bf16.msra.mxu0 %v2213_v50 }
0x104f   :  { %2223 = vmatprep.subr.bf16.mxu0 %v2345_v0 }
0x1051   :  { %2090 = vmatmul.mubr.msk.f32.vlgmr.msra.gmra.mrb[8].mxu0 %vm66_vm1, %v2554_v55 }
0x1052   :  { %2092 = vmatprep.mubr.msk.f32.mxu0 %vm66_vm1, %v2564_v56 }
0x1055   :  { %2093 = vmatmul.mubr.msk.f32.gmra.mrb[10].mxu0 %vm66_vm1, %v2569_v57 }
0x1056   :  { %2095 = vmatprep.mubr.msk.f32.mxu0 %vm66_vm1, %v2574_v58 }
0x1059   :  { %2096 = vmatmul.mubr.msk.f32.gmra.mrb[12].mxu0 %vm66_vm1, %v2585_v8 }
0x105a   :  { %2098 = vmatprep.mubr.msk.f32.mxu0 %vm66_vm1, %v2590_v59 }
0x105d   :  { %2099 = vmatmul.mubr.msk.f32.gmra.mrb[14].mxu0 %vm66_vm1, %v2599_v61 }
0x105e   :  { %2128 = vmatprep.mubr.msk.f32.mxu0 %vm2346_vm0, %v2347_v4 }
0x111c   :  { %v752_v10 = vpop.f32.mrb[6].mxu0 }
0x111d   :  { %v763_v11 = vadd.f32 %v752_v10, %v2414_v9  ;;  %v2069_v12 = vpop.f32.mrb[7].mxu0  ;;  %v756_v14 = vadd.f32 %v752_v10, %v64_v13 }
0x111f   :  { %765 = vrot.lane.b32.xlu1 %v763_v11, %s2348_s22  ;;  %v1892_v15 = vmul.f32 -1.442695, %v756_v14 }
0x1121   :  { %2301 = vpow2.f32 %v1892_v15 }
0x112b   :  { %v2302_v16 = vpop.eup %2301 }
0x112c   :  { %v760_v17 = vadd.f32 1.0, %v2302_v16  ;;  %v26_v16 = vld [vmem:[%s2864_s2 + $0x24] sm:$0x1] }
0x112d   :  { %2253 = vpush %v26_v16 }
0x112e   :  { %2303 = vrcp.f32 %v760_v17  ;;  %v2350_v17 = vmov 1966171168  }
0x1138   :  { %v2304_v18 = vpop.eup %2303 }
0x1139   :  { %v775_v24 = vsub.f32 1.0, %v2304_v18  ;;  %v781_v26 = vmul.f32 %v2304_v18, %v680_v6  ;;  %v2091_v6 = vpop.f32.mrb[8].mxu0 }
0x113a   :  { %v987_v7 = vpop.f32.mrb[9].mxu0 }
0x113b   :  { %v2094_v10 = vpop.f32.mrb[10].mxu0 }
0x113c   :  { %v997_v11 = vpop.f32.mrb[11].mxu0 }
0x113d   :  { %v2097_v12 = vpop.f32.mrb[12].mxu0 }
0x115e   :  { %s2254_s24 = spop %2253 }
0x1191   :  { %v766_v19 = vpop.permute.xlu1 %765 }
0x1192   :  { %v768_v20 = vmul.f32 %v2304_v18, %v766_v19  ;;  %v1122_v18 = vunpack.c.l.s4 %v2350_v17  ;;  %v1124_v19 = vlaneseq }
0x1194   :  { %770 = vrot.lane.b32.xlu0 %v768_v20, %s2348_s22  ;;  %v1904_v20 = vld [vmem:[%s2864_s2 + $0x22] ss:$0 sm:$0xff] }
0x1206   :  { %v771_v21 = vpop.permute.xlu0 %770 }
0x1207   :  { %v773_v22 = vadd.f32 %v771_v21, %v64_v13  ;;  %v1007_v13 = vpop.f32.mrb[13].mxu0  ;;  %v1123_v21 = vunpack.c.0.s8 %v1122_v18 }
0x1208   :  { %v2100_v14 = vpop.f32.mrb[14].mxu0 }
0x1209   :  { %2305 = vtanh.f32 %v773_v22  ;;  %v1017_v15 = vpop.f32.mrb[15].mxu0  ;;  %v2620_v22 = vshrl.u32 %v1124_v19, 7 }
0x1213   :  { %v2306_v23 = vpop.eup %2305 }
0x1214   :  { %777 = vrot.lane.b32.xlu1 %v2306_v23, %s2349_s25 }
0x1286   :  { %v778_v25 = vpop.permute.xlu1 %777 }
0x1287   :  { %v780_v27 = vmul.f32 %v778_v25, %v775_v24 }
0x1289   :  { %v2506_v28 = vadd.f32 %v781_v26, %v780_v27  ;;  %v1906_v26 = vld [vmem:[%s2864_s2 + $0x23] ss:$0 sm:$0xff]  ;;  %v1895_v27 = vld [vmem:[%s2864_s2 + $0x21] ss:$0 sm:$0xff] }
0x128a   :  { %v1018_v47 = vadd.f32 %v1895_v27, %v1017_v15 }
0x128b   :  { %784 = vrot.lane.b32.xlu0 %v2506_v28, %s2349_s25 }
0x12fd   :  { %v785_v29 = vpop.permute.xlu0 %784 }
0x12fe   :  { %2079 = vmatmul.mubr.msk.f32.vlgmr.msra.gmra.mrb[6].mxu1 %vm66_vm1, %v785_v29  ;;  %v1126_v29 = vsub.s32 %v1123_v21, %v2620_v22 }
0x12ff   :  { %2109 = vmatprep.mubr.msk.f32.mxu1 %vm2346_vm0, %v2347_v4  ;;  %2219 = vmatpush3.bf16.msra.mxu1 %v2218_v49 }
0x1300   :  { %2220 = vmatprep.subr.bf16.mxu1 %v2345_v0 }
0x1303   :  { %2222 = vmatpush3.bf16.msra.mxu1 %v2221_v54 }
0x1304   :  { %2235 = vmatprep.subr.bf16.mxu1 %v2345_v0 }
0x13d1   :  { %v854_v30 = vpop.f32.mrb[6].mxu1 }
0x13d2   :  { %v865_v31 = vadd.f32 %v854_v30, %v2414_v9  ;;  %v2080_v32 = vpop.f32.mrb[7].mxu1  ;;  %v858_v34 = vadd.f32 %v854_v30, %v65_v33 }
0x13d3   :  { %v993_v32 = vadd.f32 %v2091_v6, %v1895_v27  ;;  %v1032_v6 = vmax.f32 %v1018_v47, 0.0 }
0x13d4   :  { %867 = vrot.lane.b32.xlu1 %v865_v31, %s2348_s22  ;;  %v1894_v35 = vmul.f32 -1.442695, %v858_v34  ;;  %v988_v31 = vadd.f32 %v1895_v27, %v987_v7  ;;  %v998_v34 = vadd.f32 %v1895_v27, %v997_v11 }
0x13d5   :  { %v1027_v44 = vmax.f32 %v993_v32, 0.0 }
0x13d6   :  { %2307 = vpow2.f32 %v1894_v35  ;;  %v1026_v42 = vmax.f32 %v988_v31, 0.0  ;;  %v1028_v46 = vmax.f32 %v998_v34, 0.0  ;;  %v1262_v34 = vand.u32 127, %v1124_v19 }
0x13e0   :  { %v2308_v36 = vpop.eup %2307 }
0x13e1   :  { %v862_v37 = vadd.f32 1.0, %v2308_v36 }
0x13e3   :  { %2309 = vrcp.f32 %v862_v37  ;;  %v2630_v37 = vsub.s32 0, %v2620_v22 }
0x13ed   :  { %v2310_v38 = vpop.eup %2309 }
0x13ee   :  { %v877_v60 = vsub.f32 1.0, %v2310_v38  ;;  %v883_v63 = vmul.f32 %v2310_v38, %v2506_v28 }
0x1446   :  { %v868_v39 = vpop.permute.xlu1 %867 }
0x1447   :  { %v870_v40 = vmul.f32 %v2310_v38, %v868_v39  ;;  %v1013_v38 = vadd.f32 %v2097_v12, %v1895_v27  ;;  %v1008_v39 = vadd.f32 %v1895_v27, %v1007_v13 }
0x1449   :  { %872 = vrot.lane.b32.xlu0 %v870_v40, %s2348_s22  ;;  %v1023_v40 = vadd.f32 %v2100_v14, %v1895_v27  ;;  %v1031_v52 = vmax.f32 %v1013_v38, 0.0  ;;  %v1030_v54 = vmax.f32 %v1008_v39, 0.0 }
0x14bb   :  { %v873_v41 = vpop.permute.xlu0 %872 }
0x14bc   :  { %v875_v9 = vadd.f32 %v873_v41, %v65_v33  ;;  %v1003_v33 = vadd.f32 %v2094_v10, %v1895_v27 }
0x14be   :  { %2311 = vtanh.f32 %v875_v9  ;;  %v1029_v45 = vmax.f32 %v1003_v33, 0.0 }
0x14c8   :  { %v2312_v5 = vpop.eup %2311 }
0x14c9   :  { %879 = vrot.lane.b32.xlu1 %v2312_v5, %s2349_s25  ;;  %v1033_v5 = vmax.f32 %v1023_v40, 0.0  ;;  %v2650_v40 = vsub.s32 %v1262_v34, %v2620_v22 }
0x153b   :  { %v880_v62 = vpop.permute.xlu1 %879 }
0x153c   :  { %v882_v1 = vmul.f32 %v880_v62, %v877_v60 }
0x153e   :  { %v884_v2 = vadd.f32 %v883_v63, %v882_v1 }
0x1540   :  { %1039 = vrot.lane.b32.xlu0 %v884_v2, %s2349_s25 }
0x15b2   :  { %v2607_v3 = vpop.permute.xlu0 %1039 }
0x15b3   :  { %2110 = vmatmul.mubr.msk.f32.vlgmr.msra.gmra.mrb[8].mxu1 %vm66_vm1, %v2607_v3 }
0x15b4   :  { %2139 = vmatprep.mubr.msk.f32.mxu1 %vm2346_vm0, %v2347_v4 }
0x1686   :  { %v1109_v23 = vpop.f32.mrb[8].mxu1 }
0x1687   :  { %v1110_v24 = vadd.f32 %v1904_v20, %v1109_v23  ;;  %v2111_v25 = vpop.f32.mrb[9].mxu1 }
0x1689   :  { %v1113_v28 = vmax.f32 %v1110_v24, 0.0 }
0x168b   :  { %v1118_v30 = vmul.f32 %v1906_v26, %v1113_v28 }
0x168d   :  { %v1120_v35 = vcombine.high %v1118_v30, %v1118_v30  ;;  %v1127_v36 = vrot.slane %v1118_v30, %v1126_v29 }
0x168f   :  { %v1134_v41 = vrot.slane %v1120_v35, %v1126_v29  ;;  %v1135_v9 = vcombine.high %v1127_v36, %v1127_v36  ;;  %v1143_v43 = vrot.slane %v1127_v36, %v1126_v29  ;;  %v1243_v36 = vstv %s2254_s24 }
0x1691   :  { %v1172_v48 = vrot.slane %v1143_v43, %v2630_v37  ;;  %v1157_v49 = vrot.slane %v1135_v9, %v1126_v29  ;;  %v1165_v50 = vcombine.high %v1143_v43, %v1143_v43  ;;  %v1136_v51 = vcombine.high %v1134_v41, %v1134_v41 }
0x1692   :  { %v1150_v60 = vrot.slane %v1134_v41, %v1126_v29 }
0x1693   :  { %v1209_v62 = vmul.f32 %v1172_v48, %v1026_v42  ;;  %v1176_v63 = vrot.slane %v1157_v49, %v2630_v37  ;;  %v1167_v1 = vcombine.high %v1157_v49, %v1157_v49  ;;  %v1180_v2 = vrot.slane %v1165_v50, %v2630_v37 }
0x1694   :  { %v1164_v7 = vrot.slane %v1136_v51, %v1126_v29  ;;  %v1188_v10 = vrot.slane %v1150_v60, %v2630_v37  ;;  %v1166_v11 = vcombine.high %v1150_v60, %v1150_v60 }
0x1695   :  { %v1217_v12 = vsel %vm66_vm1, %v1209_v62, 0.0  ;;  %v1210_v13 = vmul.f32 %v1176_v63, %v1027_v44  ;;  %v1184_v14 = vrot.slane %v1167_v1, %v2630_v37  ;;  %v1211_v15 = vmul.f32 %v1180_v2, %v1028_v46 }
0x1696   :  { %1218 = vadd.xlane.f32.xlu1 %v1217_v12  ;;  %v1192_v16 = vrot.slane %v1164_v7, %v2630_v37  ;;  %v1213_v17 = vmul.f32 %v1188_v10, %v1030_v54  ;;  %v1168_v18 = vcombine.high %v1164_v7, %v1164_v7  ;;  %v1196_v20 = vrot.slane %v1166_v11, %v2630_v37 }
0x1697   :  { %v1220_v21 = vsel %vm66_vm1, %v1210_v13, 0.0  ;;  %v1212_v23 = vmul.f32 %v1184_v14, %v1029_v45  ;;  %v1223_v29 = vsel %vm66_vm1, %v1211_v15, 0.0 }
0x1698   :  { %1221 = vadd.xlane.f32.xlu0 %v1220_v21  ;;  %v1214_v24 = vmul.f32 %v1192_v16, %v1031_v52  ;;  %v1200_v25 = vrot.slane %v1168_v18, %v2630_v37  ;;  %v1215_v26 = vmul.f32 %v1196_v20, %v1032_v6  ;;  %v1229_v31 = vsel %vm66_vm1, %v1213_v17, 0.0 }
0x1699   :  { %v1226_v27 = vsel %vm66_vm1, %v1212_v23, 0.0  ;;  %v2351_v16 = vmov 0   ;;  %v1321_v17 = vsub.s32 1, %v2620_v22  ;;  %v1325_v18 = vsub.s32 2, %v2620_v22 }
0x169a   :  { %1227 = vadd.xlane.f32.xlu1 %v1226_v27  ;;  %v1216_v28 = vmul.f32 %v1200_v25, %v1033_v5  ;;  %v1232_v30 = vsel %vm66_vm1, %v1214_v24, 0.0  ;;  %v1235_v33 = vsel %vm66_vm1, %v1215_v26, 0.0  ;;  %2264 = vset.pattern.permute.xlu0 %v2351_v16  ;;  %v1329_v20 = vsub.s32 3, %v2620_v22 }
0x169b   :  { %2263 = vset.pattern.permute.xlu1 %v2351_v16  ;;  %v1333_v26 = vsub.s32 4, %v2620_v22 }
0x169c   :  { %1224 = vadd.xlane.f32.xlu0 %v1223_v29  ;;  %v1238_v32 = vsel %vm66_vm1, %v1216_v28, 0.0 }
0x169e   :  { %1233 = vadd.xlane.f32.xlu1 %v1232_v30 }
0x16a0   :  { %1230 = vadd.xlane.f32.xlu0 %v1229_v31 }
0x16a2   :  { %1239 = vadd.xlane.f32.xlu1 %v1238_v32 }
0x16a4   :  { %1236 = vadd.xlane.f32.xlu0 %v1235_v33  ;;  %v1337_v33 = vsub.s32 5, %v2620_v22 }
0x1723   :  { %v1219_v35 = vpop.xlane.xlu1 %1218 }
0x1724   :  { %v1245_v41 = vadd.f32 %v1243_v36, %v1219_v35 }
0x1725   :  { %v1222_v38 = vpop.xlane.xlu0 %1221 }
0x1726   :  { %v1246_v39 = vadd.f32 %v1243_v36, %v1222_v38  ;;  %v1266_v45 = vrot.slane %v1245_v41, %v2650_v40  ;;  %v1341_v38 = vsub.s32 6, %v2620_v22 }
0x1727   :  { %v1228_v9 = vpop.xlane.xlu1 %1227 }
0x1728   :  { %v1270_v42 = vrot.slane %v1246_v39, %v2650_v40  ;;  %v1248_v46 = vadd.f32 %v1243_v36, %v1228_v9 }
0x1729   :  { %v1225_v43 = vpop.xlane.xlu0 %1224 }
0x172a   :  { %v1247_v44 = vadd.f32 %v1243_v36, %v1225_v43  ;;  %v1296_v48 = vsel %vm1295_vm2, %v1270_v42, %v1266_v45  ;;  %v1278_v52 = vrot.slane %v1248_v46, %v2650_v40 }
0x172b   :  { %v1234_v47 = vpop.xlane.xlu1 %1233 }
0x172c   :  { %v1274_v19 = vrot.slane %v1247_v44, %v2650_v40  ;;  %v1250_v54 = vadd.f32 %v1243_v36, %v1234_v47 }
0x172d   :  { %v1231_v49 = vpop.xlane.xlu0 %1230 }
0x172e   :  { %v1298_v50 = vsel %vm1297_vm3, %v1274_v19, %v1296_v48  ;;  %v1249_v51 = vadd.f32 %v1243_v36, %v1231_v49  ;;  %v1286_v7 = vrot.slane %v1250_v54, %v2650_v40 }
0x172f   :  { %v1240_v5 = vpop.xlane.xlu1 %1239  ;;  %v1300_v62 = vsel %vm1299_vm4, %v1278_v52, %v1298_v50 }
0x1730   :  { %v1282_v60 = vrot.slane %v1249_v51, %v2650_v40  ;;  %v2660_v63 = vadd.f32 %v1243_v36, %v1240_v5 }
0x1731   :  { %v1237_v1 = vpop.xlane.xlu0 %1236 }
0x1732   :  { %v1302_v2 = vsel %vm1301_vm5, %v1282_v60, %v1300_v62  ;;  %v1251_v6 = vadd.f32 %v1243_v36, %v1237_v1  ;;  %v1294_v11 = vrot.slane %v2660_v63, %v2650_v40 }
0x1733   :  { %v1304_v12 = vsel %vm1303_vm6, %v1286_v7, %v1302_v2 }
0x1734   :  { %v1290_v10 = vrot.slane %v1251_v6, %v2650_v40 }
0x1736   :  { %v1306_v13 = vsel %vm1305_vm7, %v1290_v10, %v1304_v12 }
0x1737   :  { %v1308_v14 = vsel %vm1307_vm8, %v1294_v11, %v1306_v13 }
0x1738   :  { %v1311_v15 = vsel %vm1310_vm9, %v1308_v14, -inf }
0x1739   :  { %1312 = vmax.xlane.f32.xlu0 %v1311_v15 }
0x17c6   :  { %v1313_v21 = vpop.xlane.xlu0 %1312 }
0x17c7   :  { %v1318_v23 = vrot.slane %v1313_v21, %v2630_v37  ;;  %v1322_v24 = vrot.slane %v1313_v21, %v1321_v17  ;;  %v1326_v25 = vrot.slane %v1313_v21, %v1325_v18  ;;  %v1330_v27 = vrot.slane %v1313_v21, %v1329_v20 }
0x17c8   :  { %v1334_v34 = vrot.slane %v1313_v21, %v1333_v26  ;;  %v1338_v9 = vrot.slane %v1313_v21, %v1337_v33  ;;  %v1342_v43 = vrot.slane %v1313_v21, %v1341_v38 }
0x17c9   :  { %v1355_v28 = vsub.f32 %v1245_v41, %v1318_v23  ;;  %v1356_v29 = vsub.f32 %v1246_v39, %v1322_v24  ;;  %v1357_v30 = vsub.f32 %v1247_v44, %v1326_v25  ;;  %v1358_v35 = vsub.f32 %v1248_v46, %v1330_v27 }
0x17ca   :  { %v1359_v42 = vsub.f32 %v1249_v51, %v1334_v34  ;;  %v1345_v41 = vsub.s32 7, %v2620_v22  ;;  %v1360_v44 = vsub.f32 %v1250_v54, %v1338_v9  ;;  %v1361_v48 = vsub.f32 %v1251_v6, %v1342_v43 }
0x17cb   :  { %v1363_v31 = vmul.f32 1.442695, %v1355_v28  ;;  %v1365_v32 = vmul.f32 1.442695, %v1356_v29  ;;  %v1367_v36 = vmul.f32 1.442695, %v1357_v30 }
0x17cc   :  { %v1369_v39 = vmul.f32 1.442695, %v1358_v35  ;;  %v1371_v45 = vmul.f32 1.442695, %v1359_v42  ;;  %v1346_v19 = vrot.slane %v1313_v21, %v1345_v41  ;;  %v1373_v49 = vmul.f32 1.442695, %v1360_v44 }
0x17cd   :  { %2313 = vpow2.f32 %v1363_v31  ;;  %v1375_v52 = vmul.f32 1.442695, %v1361_v48 }
0x17ce   :  { %2315 = vpow2.f32 %v1365_v32  ;;  %v1362_v51 = vsub.f32 %v2660_v63, %v1346_v19 }
0x17cf   :  { %2317 = vpow2.f32 %v1367_v36 }
0x17d0   :  { %2319 = vpow2.f32 %v1369_v39  ;;  %v1377_v5 = vmul.f32 1.442695, %v1362_v51 }
0x17d1   :  { %2321 = vpow2.f32 %v1371_v45 }
0x17d2   :  { %2323 = vpow2.f32 %v1373_v49 }
0x17d3   :  { %2325 = vpow2.f32 %v1375_v52 }
0x17d4   :  { %2327 = vpow2.f32 %v1377_v5 }
0x17d7   :  { %v2314_v46 = vpop.eup %2313 }
0x17d8   :  { %v2691_v47 = vpop.eup %2315  ;;  %1388 = vperm.xlu1 %2263, %v2314_v46  }
0x17d9   :  { %1391 = vperm.xlu0 %2264, %v2691_v47   ;;  %v2696_v50 = vpop.eup %2317 }
0x17da   :  { %v2700_v54 = vpop.eup %2319 }
0x17db   :  { %v2703_v60 = vpop.eup %2321 }
0x17dc   :  { %1394 = vperm.xlu1 %2263, %v2696_v50   ;;  %v2706_v62 = vpop.eup %2323 }
0x17dd   :  { %v2709_v1 = vpop.eup %2325 }
0x17de   :  { %v2712_v63 = vpop.eup %2327 }
0x17e0   :  { %1397 = vperm.xlu1 %2263, %v2700_v54  }
0x17e4   :  { %1400 = vperm.xlu1 %2263, %v2703_v60  }
0x17e8   :  { %1403 = vperm.xlu1 %2263, %v2706_v62  }
0x17ec   :  { %1406 = vperm.xlu1 %2263, %v2709_v1  }
0x17f0   :  { %1409 = vperm.xlu1 %2263, %v2712_v63  }
0x1857   :  { %v1389_v2 = vpop.permute.xlu1 %1388 }
0x1858   :  { %v1392_v11 = vpop.permute.xlu0 %1391  ;;  %v1414_v14 = vrot.slane %v1389_v2, %v2650_v40 }
0x1859   :  { %v1418_v13 = vrot.slane %v1392_v11, %v2650_v40 }
0x185b   :  { %v1395_v6 = vpop.permute.xlu1 %1394  ;;  %v1443_v24 = vsel %vm1295_vm2, %v1418_v13, %v1414_v14  ;;  %v49_v13 = vld [vmem:[%s2864_s2 + $0xc0] sm:$0xff] }
0x185c   :  { %v1422_v15 = vrot.slane %v1395_v6, %v2650_v40 }
0x185e   :  { %v1444_v27 = vsel %vm1297_vm3, %v1422_v15, %v1443_v24 }
0x185f   :  { %v1398_v7 = vpop.permute.xlu1 %1397 }
0x1860   :  { %v1426_v16 = vrot.slane %v1398_v7, %v2650_v40  ;;  %v46_v7 = vld [vmem:[%s2864_s2 + $0xa8] sm:$0xff] }
0x1862   :  { %v1445_v29 = vsel %vm1299_vm4, %v1426_v16, %v1444_v27 }
0x1863   :  { %v1401_v10 = vpop.permute.xlu1 %1400 }
0x1864   :  { %v1430_v21 = vrot.slane %v1401_v10, %v2650_v40  ;;  %v47_v10 = vld [vmem:[%s2864_s2 + $0xb0] sm:$0xff] }
0x1865   :  { %v2230_v11 = vpack.c.bf16 %v47_v10, %v46_v7 }
0x1866   :  { %v1446_v30 = vsel %vm1301_vm5, %v1430_v21, %v1445_v29 }
0x1867   :  { %v1404_v12 = vpop.permute.xlu1 %1403 }
0x1868   :  { %v1434_v25 = vrot.slane %v1404_v12, %v2650_v40  ;;  %v48_v12 = vld [vmem:[%s2864_s2 + $0xb8] sm:$0xff] }
0x1869   :  { %v2233_v14 = vpack.c.bf16 %v49_v13, %v48_v12 }
0x186a   :  { %v1447_v32 = vsel %vm1303_vm6, %v1434_v25, %v1446_v30 }
0x186b   :  { %v1407_v23 = vpop.permute.xlu1 %1406 }
0x186c   :  { %v1438_v28 = vrot.slane %v1407_v23, %v2650_v40 }
0x186e   :  { %v1448_v35 = vsel %vm1305_vm7, %v1438_v28, %v1447_v32 }
0x186f   :  { %v1410_v31 = vpop.permute.xlu1 %1409 }
0x1870   :  { %v1442_v34 = vrot.slane %v1410_v31, %v2650_v40 }
0x1872   :  { %v1449_v36 = vsel %vm1307_vm8, %v1442_v34, %v1448_v35 }
0x1873   :  { %v1451_v9 = vsel %vm1310_vm9, %v1449_v36, 0.0 }
0x1874   :  { %1452 = vadd.xlane.f32.xlu1 %v1451_v9 }
0x1901   :  { %v1453_v42 = vpop.xlane.xlu1 %1452 }
0x1902   :  { %v1458_v39 = vrot.slane %v1453_v42, %v2630_v37  ;;  %v1462_v43 = vrot.slane %v1453_v42, %v1321_v17  ;;  %v1466_v44 = vrot.slane %v1453_v42, %v1325_v18  ;;  %v1470_v40 = vrot.slane %v1453_v42, %v1329_v20 }
0x1903   :  { %v1474_v19 = vrot.slane %v1453_v42, %v1333_v26  ;;  %v1478_v37 = vrot.slane %v1453_v42, %v1337_v33  ;;  %v1482_v18 = vrot.slane %v1453_v42, %v1341_v38  ;;  %v1486_v26 = vrot.slane %v1453_v42, %v1345_v41  ;;  %v42_v41 = vld [vmem:[%s2864_s2 + $0x88] sm:$0xff] }
0x1904   :  { %2329 = vrcp.f32 %v1458_v39 }
0x1905   :  { %2331 = vrcp.f32 %v1462_v43 }
0x1906   :  { %2333 = vrcp.f32 %v1466_v44 }
0x1907   :  { %2335 = vrcp.f32 %v1470_v40 }
0x1908   :  { %2337 = vrcp.f32 %v1474_v19 }
0x1909   :  { %2339 = vrcp.f32 %v1478_v37 }
0x190a   :  { %2341 = vrcp.f32 %v1482_v18 }
0x190b   :  { %2343 = vrcp.f32 %v1486_v26 }
0x190e   :  { %v2330_v45 = vpop.eup %2329 }
0x190f   :  { %v1496_v48 = vmul.f32 %v2330_v45, %v2314_v46  ;;  %v2332_v49 = vpop.eup %2331 }
0x1910   :  { %v1498_v17 = vmul.f32 %v2332_v49, %v2691_v47  ;;  %v2334_v51 = vpop.eup %2333 }
0x1911   :  { %1513 = vperm.xlu0 %2264, %v1496_v48   ;;  %v1500_v20 = vmul.f32 %v2334_v51, %v2696_v50  ;;  %v2336_v52 = vpop.eup %2335 }
0x1912   :  { %v1502_v46 = vmul.f32 %v2336_v52, %v2700_v54  ;;  %v2338_v5 = vpop.eup %2337  ;;  %v43_v54 = vld [vmem:[%s2864_s2 + $0x90] sm:$0xff] }
0x1913   :  { %v1504_v33 = vmul.f32 %v2338_v5, %v2703_v60  ;;  %v2340_v47 = vpop.eup %2339  ;;  %v44_v60 = vld [vmem:[%s2864_s2 + $0x98] sm:$0xff] }
0x1914   :  { %v1506_v2 = vmul.f32 %v2340_v47, %v2706_v62  ;;  %v2342_v38 = vpop.eup %2341  ;;  %v2224_v62 = vpack.c.bf16 %v43_v54, %v42_v41 }
0x1915   :  { %1518 = vperm.xlu0 %2264, %v1498_v17   ;;  %v1508_v50 = vmul.f32 %v2342_v38, %v2709_v1  ;;  %v2344_v6 = vpop.eup %2343  ;;  %v45_v1 = vld [vmem:[%s2864_s2 + $0xa0] sm:$0xff] }
0x1916   :  { %v1510_v22 = vmul.f32 %v2344_v6, %v2712_v63  ;;  %2225 = vmatpush3.bf16.msra.mxu0 %v2224_v62  ;;  %v2227_v63 = vpack.c.bf16 %v45_v1, %v44_v60 }
0x1917   :  { %2226 = vmatprep.subr.bf16.mxu0 %v2345_v0 }
0x1919   :  { %1523 = vperm.xlu0 %2264, %v1500_v20  }
0x191a   :  { %2228 = vmatpush3.bf16.msra.mxu0 %v2227_v63 }
0x191b   :  { %2229 = vmatprep.subr.bf16.mxu0 %v2345_v0 }
0x191d   :  { %1528 = vperm.xlu0 %2264, %v1502_v46  }
0x191e   :  { %2231 = vmatpush3.bf16.msra.mxu0 %v2230_v11 }
0x191f   :  { %2232 = vmatprep.subr.bf16.mxu0 %v2345_v0 }
0x1921   :  { %1533 = vperm.xlu0 %2264, %v1504_v33  }
0x1922   :  { %2234 = vmatpush3.bf16.msra.mxu0 %v2233_v14 }
0x1925   :  { %1538 = vperm.xlu0 %2264, %v1506_v2  }
0x1929   :  { %1543 = vperm.xlu0 %2264, %v1508_v50  }
0x192d   :  { %1548 = vperm.xlu0 %2264, %v1510_v22  }
0x1990   :  { %v1514_v15 = vpop.permute.xlu0 %1513 }
0x1991   :  { %v1551_v24 = vmul.f32 %v1514_v15, %v2546_v53 }
0x1993   :  { %v1559_v30 = vsel %vm66_vm1, %v1551_v24, 0.0 }
0x1994   :  { %v1519_v16 = vpop.permute.xlu0 %1518  ;;  %v1560_v36 = vrot.slane %v1559_v30, 4 }
0x1995   :  { %v1552_v21 = vmul.f32 %v1519_v16, %v2554_v55 }
0x1996   :  { %v1561_v43 = vadd.f32 %v1560_v36, %v1559_v30 }
0x1997   :  { %v1566_v27 = vsel %vm66_vm1, %v1552_v21, 0.0 }
0x1998   :  { %v1524_v23 = vpop.permute.xlu0 %1523  ;;  %v1567_v32 = vrot.slane %v1566_v27, 4  ;;  %v1562_v17 = vrot.slane %v1561_v43, 2 }
0x1999   :  { %v1553_v25 = vmul.f32 %v1524_v23, %v2564_v56 }
0x199a   :  { %v1568_v42 = vadd.f32 %v1567_v32, %v1566_v27  ;;  %v1563_v47 = vadd.f32 %v1562_v17, %v1561_v43  ;;  %v39_v43 = vld [vmem:[%s2864_s2 + $0x70] sm:$0xff]  ;;  %v50_v17 = vld [vmem:[%s2864_s2 + $0xc8] sm:$0xff] }
0x199b   :  { %v1573_v28 = vsel %vm66_vm1, %v1553_v25, 0.0 }
0x199c   :  { %v1529_v29 = vpop.permute.xlu0 %1528  ;;  %v1574_v34 = vrot.slane %v1573_v28, 4 }
0x199d   :  { %v1554_v31 = vmul.f32 %v1529_v29, %v2569_v57  ;;  %v1569_v57 = vrot.slane %v1568_v42, 2 }
0x199e   :  { %v1575_v56 = vadd.f32 %v1574_v34, %v1573_v28 }
0x199f   :  { %v1580_v35 = vsel %vm66_vm1, %v1554_v31, 0.0  ;;  %v1570_v26 = vadd.f32 %v1569_v57, %v1568_v42 }
0x19a0   :  { %v1581_v55 = vrot.slane %v1580_v35, 4  ;;  %v1534_v9 = vpop.permute.xlu0 %1533  ;;  %v1576_v49 = vrot.slane %v1575_v56, 2 }
0x19a1   :  { %v1555_v53 = vmul.f32 %v1534_v9, %v2574_v58  ;;  %v1571_v41 = vrot.slane %v1570_v26, 1 }
0x19a2   :  { %v1582_v44 = vadd.f32 %v1581_v55, %v1580_v35  ;;  %v1577_v5 = vadd.f32 %v1576_v49, %v1575_v56 }
0x19a3   :  { %v1587_v39 = vsel %vm66_vm1, %v1555_v53, 0.0  ;;  %v1572_v12 = vadd.f32 %v1571_v41, %v1570_v26  ;;  %v53_v26 = vld [vmem:[%s2864_s2 + $0xe0] sm:$0xff] }
0x19a4   :  { %v1588_v40 = vrot.slane %v1587_v39, 4  ;;  %v1539_v45 = vpop.permute.xlu0 %1538  ;;  %v1583_v51 = vrot.slane %v1582_v44, 2  ;;  %v1578_v62 = vrot.slane %v1577_v5, 1 }
0x19a5   :  { %v1556_v19 = vmul.f32 %v1539_v45, %v2585_v8  ;;  %v41_v45 = vld [vmem:[%s2864_s2 + $0x80] sm:$0xff] }
0x19a6   :  { %v1589_v48 = vadd.f32 %v1588_v40, %v1587_v39  ;;  %v1584_v2 = vadd.f32 %v1583_v51, %v1582_v44  ;;  %v1579_v16 = vadd.f32 %v1578_v62, %v1577_v5  ;;  %v38_v39 = vld [vmem:[%s2864_s2 + $0x68] sm:$0xff]  ;;  %v40_v44 = vld [vmem:[%s2864_s2 + $0x78] sm:$0xff]  ;;  %v51_v51 = vld [vmem:[%s2864_s2 + $0xd0] sm:$0xff] }
0x19a7   :  { %v1594_v37 = vsel %vm66_vm1, %v1556_v19, 0.0  ;;  %v2236_v40 = vpack.c.bf16 %v39_v43, %v38_v39  ;;  %v1907_v19 = vld [vmem:[%s2864_s2 + $0x25] ss:$0 sm:$0xff]  ;;  %v54_v5 = vld [vmem:[%s2864_s2 + $0xe8] sm:$0xff] }
0x19a8   :  { %v1595_v18 = vrot.slane %v1594_v37, 4  ;;  %v1544_v20 = vpop.permute.xlu0 %1543  ;;  %v1590_v58 = vrot.slane %v1589_v48, 2  ;;  %v1585_v63 = vrot.slane %v1584_v2, 1 }
0x19a9   :  { %v1557_v52 = vmul.f32 %v1544_v20, %v2590_v59  ;;  %v1564_v59 = vrot.slane %v1563_v47, 1  ;;  %2237 = vmatpush3.bf16.msra.mxu1 %v2236_v40  ;;  %v2242_v20 = vpack.c.bf16 %v51_v51, %v50_v17 }
0x19aa   :  { %v1596_v46 = vadd.f32 %v1595_v18, %v1594_v37  ;;  %v1591_v6 = vadd.f32 %v1590_v58, %v1589_v48  ;;  %v1586_v23 = vadd.f32 %v1585_v63, %v1584_v2  ;;  %2238 = vmatprep.subr.bf16.mxu1 %v2345_v0  ;;  %v57_v2 = vld [vmem:[%s2864_s2 + $0x100] sm:$0xff] }
0x19ab   :  { %v1601_v33 = vsel %vm66_vm1, %v1557_v52, 0.0  ;;  %v1565_v21 = vadd.f32 %v1564_v59, %v1563_v47  ;;  %v52_v52 = vld [vmem:[%s2864_s2 + $0xd8] sm:$0xff] }
0x19ac   :  { %v1597_v8 = vrot.slane %v1596_v46, 2  ;;  %v1602_v38 = vrot.slane %v1601_v33, 4  ;;  %v1549_v50 = vpop.permute.xlu0 %1548  ;;  %v1592_v11 = vrot.slane %v1591_v6, 1 }
0x19ad   :  { %v1558_v22 = vmul.f32 %v1549_v50, %v2599_v61  ;;  %v1624_v27 = vsel %vm1295_vm2, %v1572_v12, %v1565_v21 }
0x19ae   :  { %v1598_v54 = vadd.f32 %v1597_v8, %v1596_v46  ;;  %v1603_v60 = vadd.f32 %v1602_v38, %v1601_v33  ;;  %v1593_v25 = vadd.f32 %v1592_v11, %v1591_v6  ;;  %v1625_v30 = vsel %vm1297_vm3, %v1579_v16, %v1624_v27  ;;  %v55_v33 = vld [vmem:[%s2864_s2 + $0xf0] sm:$0xff]  ;;  %v1909_v38 = vld [vmem:[%s2864_s2 + $0x26] ss:$0 sm:$0xff] }
0x19af   :  { %v1608_v1 = vsel %vm66_vm1, %v1558_v22, 0.0  ;;  %v1626_v34 = vsel %vm1299_vm4, %v1586_v23, %v1625_v30  ;;  %v2245_v46 = vpack.c.bf16 %v53_v26, %v52_v52  ;;  %v2248_v47 = vpack.c.bf16 %v55_v33, %v54_v5 }
0x19b0   :  { %v1604_v7 = vrot.slane %v1603_v60, 2  ;;  %v1609_v10 = vrot.slane %v1608_v1, 4  ;;  %v1599_v13 = vrot.slane %v1598_v54, 1  ;;  %v1627_v35 = vsel %vm1301_vm5, %v1593_v25, %v1626_v34 }
0x19b2   :  { %v1605_v14 = vadd.f32 %v1604_v7, %v1603_v60  ;;  %v1610_v15 = vadd.f32 %v1609_v10, %v1608_v1  ;;  %v1600_v28 = vadd.f32 %v1599_v13, %v1598_v54 }
0x19b4   :  { %v1606_v24 = vrot.slane %v1605_v14, 1  ;;  %v1611_v61 = vrot.slane %v1610_v15, 2  ;;  %v1628_v55 = vsel %vm1303_vm6, %v1600_v28, %v1627_v35 }
0x19b6   :  { %v1612_v29 = vadd.f32 %v1611_v61, %v1610_v15  ;;  %v1607_v31 = vadd.f32 %v1606_v24, %v1605_v14 }
0x19b8   :  { %v1613_v32 = vrot.slane %v1612_v29, 1  ;;  %v1629_v9 = vsel %vm1305_vm7, %v1607_v31, %v1628_v55 }
0x19ba   :  { %v1614_v36 = vadd.f32 %v1613_v32, %v1612_v29 }
0x19bc   :  { %v1630_v53 = vsel %vm1307_vm8, %v1614_v36, %v1629_v9 }
0x19bd   :  { %1631 = vrot.lane.b32.xlu1 %v1630_v53, %s2352_s15 }
0x1a2f   :  { %v1632_v42 = vpop.permute.xlu1 %1631 }
0x1a30   :  { %v1634_v56 = vsel %vm66_vm1, %v2607_v3, %v1632_v42  ;;  %v2239_v3 = vpack.c.bf16 %v41_v45, %v40_v44 }
0x1a31   :  { %2129 = vmatmul.mubr.msk.f32.vlgmr.msra.gmra.mrb[16].mxu0 %vm1639_vm10, %v1634_v56 }
0x1a32   :  { %2240 = vmatpush3.bf16.msra.mxu1 %v2239_v3 }
0x1a33   :  { %2241 = vmatprep.subr.bf16.mxu1 %v2345_v0 }
0x1b04   :  { %v1709_v57 = vpop.f32.mrb[16].mxu0 }
0x1b05   :  { %v1710_v48 = vadd.f32 %v1907_v19, %v1709_v57  ;;  %v2130_v49 = vpop.f32.mrb[17].mxu0 }
0x1b07   :  { %v1713_v37 = vmax.f32 %v1710_v48, 0.0 }
0x1b09   :  { %1715 = vrot.lane.b32.xlu0 %v1713_v37, %s2349_s25 }
0x1b7b   :  { %v1716_v18 = vpop.permute.xlu0 %1715 }
0x1b7c   :  { %v1718_v58 = vmul.f32 %v1716_v18, %v1713_v37 }
0x1b7e   :  { %2140 = vmatmul.mubr.msk.f32.vlgmr.msra.gmra.mrb[10].mxu1 %vm66_vm1, %v1718_v58 }
0x1b7f   :  { %2243 = vmatpush3.bf16.msra.mxu1 %v2242_v20  ;;  %2158 = vmatprep.mubr.msk.f32.mxu1 %vm2346_vm0, %v2347_v4  ;;  %v56_v4 = vld [vmem:[%s2864_s2 + $0xf8] sm:$0xff] }
0x1b80   :  { %2244 = vmatprep.subr.bf16.mxu1 %v2345_v0  ;;  %v2251_v8 = vpack.c.bf16 %v57_v2, %v56_v4 }
0x1b83   :  { %2246 = vmatpush3.bf16.msra.mxu1 %v2245_v46 }
0x1b84   :  { %2247 = vmatprep.subr.bf16.mxu1 %v2345_v0 }
0x1b87   :  { %2249 = vmatpush3.bf16.msra.mxu1 %v2248_v47 }
0x1b88   :  { %2250 = vmatprep.subr.bf16.mxu1 %v2345_v0  ;;  %v1911_v0 = vld [vmem:[%s2864_s2 + $0x27] ss:$0 sm:$0xff] }
0x1b8b   :  { %2252 = vmatpush3.bf16.msra.mxu1 %v2251_v8 }
0x1c51   :  { %v1792_v50 = vpop.f32.mrb[10].mxu1 }
0x1c52   :  { %v1793_v6 = vadd.f32 %v1909_v38, %v1792_v50  ;;  %v2141_v22 = vpop.f32.mrb[11].mxu1 }
0x1c54   :  { %v1796_v41 = vmax.f32 %v1793_v6, 0.0 }
0x1c56   :  { %2159 = vmatmul.mubr.msk.f32.vlgmr.msra.gmra.mrb[12].mxu1 %vm1639_vm10, %v1796_v41 }
0x1d29   :  { %v1870_v54 = vpop.f32.mrb[12].mxu1 }
0x1d2a   :  { %v1871_v60 = vadd.f32 %v1911_v0, %v1870_v54  ;;  %v2160_v62 = vpop.f32.mrb[13].mxu1 }
0x1d2c   :  { %1874 = vst [vmem:[%s2867_s3] sm:$0xff] %v1871_v60 }

</bundles_post_ra>
